<compile_context>
chip_gen: v5e
topology: v5e:2x2
jax: 0.10.0
libtpu: 0.0.40
codegen_flags: <defaults>
</compile_context>

<pallas_src>
import math
from functools import partial

import jax
import jax.numpy as jnp
from jax.experimental import pallas as pl
from jax.experimental.pallas import tpu as pltpu


def _round_up(x, m):
    return ((x + m - 1) // m) * m


# ---------------------------------------------------------------------------
# Kernel: TB batch elements (lanes) x N points per grid step.
# ---------------------------------------------------------------------------
def _critic_kernel(x_ref,                      # (3, M) f32, M = n_points * tb
                   weT_ref, beT_ref,           # (H, 3) f32, (H, 1) f32     encoder
                   w1T_ref, b1T_ref,           # (20, H) bf16, (20, 1) f32  conv1
                   w2T_ref, b2T_ref,           # (20, 20) bf16, (20, 1) f32 conv2
                   w3_ref,                     # (1, 20) f32                conv3
                   o_ref,                      # (1, tb) f32
                   *, n_points, tb):
    x = x_ref[...]                              # (3, M)
    weT = weT_ref[...]                          # (H, 3)

    # Encoder (pointwise conv, K=3) as three lane-dense broadcast FMAs on the
    # VPU, kept in f32 (v5e VPU has no bf16; K=3 would waste the MXU anyway).
    h = (weT[:, 0:1] * x[0:1, :]
         + weT[:, 1:2] * x[1:2, :]
         + weT[:, 2:3] * x[2:3, :]
         + beT_ref[...])                        # (H, M)
    h = jnp.maximum(h, 0.0)                     # relu(encoder)

    # conv1 / conv2 on the MXU with bf16 operands, f32 accumulation.
    h = jnp.dot(w1T_ref[...], h.astype(jnp.bfloat16),
                preferred_element_type=jnp.float32) + b1T_ref[...]
    h = jnp.maximum(h, 0.0)                     # (20, M)
    h = jnp.dot(w2T_ref[...], h.astype(jnp.bfloat16),
                preferred_element_type=jnp.float32) + b2T_ref[...]
    h = jnp.maximum(h, 0.0)                     # (20, M)

    # conv3 is linear after the relu: reduce over the N points first.  Columns
    # are point-major / batch-minor, so each point is a lane-aligned TB-wide
    # static slice; tree-reduce them, then one tiny matmul -> (1, TB).
    parts = [h[:, n * tb:(n + 1) * tb] for n in range(n_points)]
    while len(parts) > 1:
        nxt = [parts[i] + parts[i + 1] for i in range(0, len(parts) - 1, 2)]
        if len(parts) % 2:
            nxt.append(parts[-1])
        parts = nxt
    s = parts[0]                                # (20, tb)

    o_ref[...] = jnp.dot(w3_ref[...], s, preferred_element_type=jnp.float32)


def critic_pallas(loc, demand, n_agents, params, tb=None):
    """loc: (B, N, 2) f32, demand: (B, N - n_agents) f32 -> (B, 1) f32."""
    B, N, _ = loc.shape
    f32 = jnp.float32
    we, be, w1, b1, w2, b2, w3t, b3 = params
    hidden = we.shape[1]

    # ---- batch tile: multiple of 128 lanes, sized from N and a VMEM target.
    if tb is None:
        m_target = 8192                               # per-point rows per grid step
        tb = max(128, min(1024, (m_target // max(N, 1)) // 128 * 128))
    tb = max(128, (tb // 128) * 128)
    tb = min(tb, _round_up(B, 128))
    b_pad = _round_up(B, tb)
    # v7x has 2 TensorCores: prefer >=2 "parallel" grid steps when B allows it.
    while b_pad // tb < 2 and tb > 128:
        tb = max(128, (tb // 2) // 128 * 128)
        b_pad = _round_up(B, tb)
    g = b_pad // tb
    pad = b_pad - B
    m_blk = N * tb
    # TODO(synk): for very large N, add a point-tile grid axis (masking padded
    # points before the sum) so m_blk stays bounded.

    # ---- pack [x, y, aug_demand] into one lane-dense (3, B_pad*N) array whose
    # per-step block is contiguous, column order = (point-major, batch-minor).
    aug_demand = jnp.concatenate(
        [-jnp.ones((B, n_agents), f32), demand.astype(f32)], axis=1)        # (B, N)
    feat = jnp.stack([loc[..., 0].astype(f32), loc[..., 1].astype(f32),
                      aug_demand], axis=0)                                   # (3, B, N)
    feat = jnp.pad(feat, ((0, 0), (0, pad), (0, 0)))                         # (3, B_pad, N)
    feat = feat.reshape(3, g, tb, N).transpose(0, 1, 3, 2)                   # (3, g, N, tb)
    inp = feat.reshape(3, g * m_blk)                                         # (3, B_pad*N)

    # ---- stage weights in the kernel layout (transposed; bf16 for MXU layers).
    weT = we.T.astype(f32)                        # (H, 3)
    beT = be.reshape(hidden, 1).astype(f32)       # (H, 1)
    w1T = w1.T.astype(jnp.bfloat16)               # (20, H)
    b1T = b1.reshape(20, 1).astype(f32)           # (20, 1)
    w2T = w2.T.astype(jnp.bfloat16)               # (20, 20)
    b2T = b2.reshape(20, 1).astype(f32)           # (20, 1)
    w3 = w3t.astype(f32)                          # (1, 20)

    # ---- explicit VMEM budget + cost estimate for this block size.
    act_bytes = (_round_up(hidden, 8) * (4 + 2)
                 + 2 * _round_up(20, 8) * (4 + 2)) * m_blk                   # f32 + bf16 copies
    in_bytes = 2 * 8 * m_blk * 4                  # double-buffered (3->8 sublane) input
    vmem_limit = int(min(max(2 * (act_bytes + in_bytes) + (1 << 20), 4 << 20),
                         32 << 20))

    flops = 2 * b_pad * N * (3 * hidden + hidden * 20 + 20 * 20 + 20)
    bytes_accessed = (3 * b_pad * N * 4 + b_pad * 4
                      + (3 * hidden + hidden) * 4
                      + (20 * hidden + 20 * 20) * 2 + 60 * 4)

    out2d = pl.pallas_call(
        partial(_critic_kernel, n_points=N, tb=tb),
        out_shape=jax.ShapeDtypeStruct((1, b_pad), f32),
        grid=(g,),
        in_specs=[
            pl.BlockSpec((3, m_blk), lambda i: (0, i)),
            pl.BlockSpec((hidden, 3), lambda i: (0, 0)),
            pl.BlockSpec((hidden, 1), lambda i: (0, 0)),
            pl.BlockSpec((20, hidden), lambda i: (0, 0)),
            pl.BlockSpec((20, 1), lambda i: (0, 0)),
            pl.BlockSpec((20, 20), lambda i: (0, 0)),
            pl.BlockSpec((20, 1), lambda i: (0, 0)),
            pl.BlockSpec((1, 20), lambda i: (0, 0)),
        ],
        out_specs=pl.BlockSpec((1, tb), lambda i: (0, i)),
        compiler_params=pltpu.CompilerParams(
            dimension_semantics=("parallel",),
            vmem_limit_bytes=vmem_limit),
        cost_estimate=pl.CostEstimate(flops=flops, transcendentals=0,
                                      bytes_accessed=bytes_accessed),
    )(inp, weT, beT, w1T, b1T, w2T, b2T, w3)

    # conv3 bias contributes b3 once per point -> fold N * b3 outside the kernel.
    out = out2d[0, :B].reshape(B, 1) + f32(N) * b3.reshape(1, 1)
    return out


# ---------------------------------------------------------------------------
# Deterministic parameter init (xavier_uniform for weights, as in __init__;
# PyTorch Conv1d default uniform for biases).  Stored in "math" layout; the
# wrapper transposes / casts into the kernel layout.
# ---------------------------------------------------------------------------
def _xavier_uniform(key, shape, fan_in, fan_out):
    bound = math.sqrt(6.0 / (fan_in + fan_out))
    return jax.random.uniform(key, shape, jnp.float32, -bound, bound)


def _conv_bias(key, c_in, c_out):
    bound = 1.0 / math.sqrt(c_in)
    return jax.random.uniform(key, (1, c_out), jnp.float32, -bound, bound)


def init_params(key, c_in, hidden):
    ks = jax.random.split(key, 8)
    we = _xavier_uniform(ks[0], (c_in, hidden), c_in, hidden)
    be = _conv_bias(ks[1], c_in, hidden)
    w1 = _xavier_uniform(ks[2], (hidden, 20), hidden, 20)
    b1 = _conv_bias(ks[3], hidden, 20)
    w2 = _xavier_uniform(ks[4], (20, 20), 20, 20)
    b2 = _conv_bias(ks[5], 20, 20)
    w3t = _xavier_uniform(ks[6], (1, 20), 20, 1)    # conv3 weight, stored transposed
    b3 = _conv_bias(ks[7], 20, 1)                   # (1, 1)
    return (we, be, w1, b1, w2, b2, w3t, b3)


# Pure-JAX f32 reference (same math, no Pallas) for a sanity check.
def critic_ref(loc, demand, n_agents, params):
    B = loc.shape[0]
    we, be, w1, b1, w2, b2, w3t, b3 = params
    aug_demand = jnp.concatenate(
        [-jnp.ones((B, n_agents), jnp.float32), demand], axis=1)
    x = jnp.concatenate([loc, aug_demand[..., None]], axis=-1)
    h = jax.nn.relu(x @ we + be)
    h = jax.nn.relu(h @ w1 + b1)
    h = jax.nn.relu(h @ w2 + b2)
    y = h @ w3t.T + b3                       # (B, N, 1)
    return jnp.sum(y, axis=1)                # (B, 1)


if __name__ == "__main__":
    key = jax.random.PRNGKey(0)
    k_loc, k_dem, k_par = jax.random.split(key, 3)

    B = 2              # batch
    n_agents = 2       # env.n_agents (depot/agent nodes get demand = -1)
    n_cust = 14        # customer nodes with real demand
    N = n_agents + n_cust   # 16 points total
    hidden = 32        # loc_encoder_params['hidden_size']
    c_in = 3           # (x, y, demand)

    loc = jax.random.uniform(k_loc, (B, N, 2), jnp.float32)
    demand = jax.random.uniform(k_dem, (B, n_cust), jnp.float32)
    params = init_params(k_par, c_in, hidden)

    out = critic_pallas(loc, demand, n_agents, params)
    out = jax.block_until_ready(out)

    ref = critic_ref(loc, demand, n_agents, params)
    assert out.shape == (B, 1), out.shape
    # conv1/conv2 use bf16 MXU operands -> loosened tolerance vs. the f32 reference.
    assert jnp.allclose(out, ref, atol=5e-2, rtol=5e-2), (out, ref)

    print("KERNEL_OK")
</pallas_src>

<mosaic_0001>
module attributes {stable_mosaic.version = 11 : i64} {
  func.func @_critic_kernel(%arg0: i32, %arg1: memref<3x2048xf32, #tpu.memory_space<vmem>>, %arg2: memref<32x3xf32, #tpu.memory_space<vmem>>, %arg3: memref<32x1xf32, #tpu.memory_space<vmem>>, %arg4: memref<20x32xbf16, #tpu.memory_space<vmem>>, %arg5: memref<20x1xf32, #tpu.memory_space<vmem>>, %arg6: memref<20x20xbf16, #tpu.memory_space<vmem>>, %arg7: memref<20x1xf32, #tpu.memory_space<vmem>>, %arg8: memref<1x20xf32, #tpu.memory_space<vmem>>, %arg9: memref<1x128xf32, #tpu.memory_space<vmem>>) attributes {dimension_semantics = [#tpu.dimension_semantics<parallel>], iteration_bounds = array<i64: 1>, scalar_prefetch = 0 : i64, scratch_operands = 0 : i64, tpu.core_type = #tpu.core_type<tc>, window_params = [{transform_indices = @transform_0, window_bounds = array<i64: 3, 2048>}, {pipeline_mode = #tpu.pipeline_mode<synchronous>, transform_indices = @transform_1, window_bounds = array<i64: 32, 3>}, {pipeline_mode = #tpu.pipeline_mode<synchronous>, transform_indices = @transform_2, window_bounds = array<i64: 32, 1>}, {pipeline_mode = #tpu.pipeline_mode<synchronous>, transform_indices = @transform_3, window_bounds = array<i64: 20, 32>}, {pipeline_mode = #tpu.pipeline_mode<synchronous>, transform_indices = @transform_4, window_bounds = array<i64: 20, 1>}, {pipeline_mode = #tpu.pipeline_mode<synchronous>, transform_indices = @transform_5, window_bounds = array<i64: 20, 20>}, {pipeline_mode = #tpu.pipeline_mode<synchronous>, transform_indices = @transform_6, window_bounds = array<i64: 20, 1>}, {pipeline_mode = #tpu.pipeline_mode<synchronous>, transform_indices = @transform_7, window_bounds = array<i64: 1, 20>}, {transform_indices = @transform_8, window_bounds = array<i64: 1, 128>}]} {
    %c0 = arith.constant 0 : index
    %c0_0 = arith.constant 0 : index
    %0 = vector.load %arg1[%c0, %c0_0] : memref<3x2048xf32, #tpu.memory_space<vmem>>, vector<3x2048xf32>
    %c0_1 = arith.constant 0 : index
    %c0_2 = arith.constant 0 : index
    %1 = vector.load %arg2[%c0_1, %c0_2] : memref<32x3xf32, #tpu.memory_space<vmem>>, vector<32x3xf32>
    %2 = vector.extract_strided_slice %1 {offsets = [0, 0], sizes = [32, 1], strides = [1, 1]} : vector<32x3xf32> to vector<32x1xf32>
    %3 = vector.extract_strided_slice %0 {offsets = [0, 0], sizes = [1, 2048], strides = [1, 1]} : vector<3x2048xf32> to vector<1x2048xf32>
    %4 = vector.broadcast %2 : vector<32x1xf32> to vector<32x2048xf32>
    %5 = vector.broadcast %3 : vector<1x2048xf32> to vector<32x2048xf32>
    %6 = arith.mulf %4, %5 : vector<32x2048xf32>
    %7 = vector.extract_strided_slice %1 {offsets = [0, 1], sizes = [32, 1], strides = [1, 1]} : vector<32x3xf32> to vector<32x1xf32>
    %8 = vector.extract_strided_slice %0 {offsets = [1, 0], sizes = [1, 2048], strides = [1, 1]} : vector<3x2048xf32> to vector<1x2048xf32>
    %9 = vector.broadcast %7 : vector<32x1xf32> to vector<32x2048xf32>
    %10 = vector.broadcast %8 : vector<1x2048xf32> to vector<32x2048xf32>
    %11 = arith.mulf %9, %10 : vector<32x2048xf32>
    %12 = arith.addf %6, %11 : vector<32x2048xf32>
    %13 = vector.extract_strided_slice %1 {offsets = [0, 2], sizes = [32, 1], strides = [1, 1]} : vector<32x3xf32> to vector<32x1xf32>
    %14 = vector.extract_strided_slice %0 {offsets = [2, 0], sizes = [1, 2048], strides = [1, 1]} : vector<3x2048xf32> to vector<1x2048xf32>
    %15 = vector.broadcast %13 : vector<32x1xf32> to vector<32x2048xf32>
    %16 = vector.broadcast %14 : vector<1x2048xf32> to vector<32x2048xf32>
    %17 = arith.mulf %15, %16 : vector<32x2048xf32>
    %18 = arith.addf %12, %17 : vector<32x2048xf32>
    %c0_3 = arith.constant 0 : index
    %c0_4 = arith.constant 0 : index
    %19 = vector.load %arg3[%c0_3, %c0_4] : memref<32x1xf32, #tpu.memory_space<vmem>>, vector<32x1xf32>
    %20 = vector.broadcast %19 : vector<32x1xf32> to vector<32x2048xf32>
    %21 = arith.addf %18, %20 : vector<32x2048xf32>
    %cst = arith.constant 0.000000e+00 : f32
    %22 = vector.broadcast %cst : f32 to vector<32x2048xf32>
    %23 = arith.maximumf %21, %22 : vector<32x2048xf32>
    %c0_5 = arith.constant 0 : index
    %c0_6 = arith.constant 0 : index
    %24 = vector.load %arg4[%c0_5, %c0_6] : memref<20x32xbf16, #tpu.memory_space<vmem>>, vector<20x32xbf16>
    %25 = arith.truncf %23 : vector<32x2048xf32> to vector<32x2048xbf16>
    %cst_7 = arith.constant dense<0.000000e+00> : vector<20x2048xf32>
    %26 = tpu.matmul %24, %25, %cst_7 {dimension_numbers = #tpu.dot_dimension_numbers<[1], [0], [0], [1], [0, 0, 1, 1], [], []>} : vector<20x32xbf16>, vector<32x2048xbf16>, vector<20x2048xf32> -> vector<20x2048xf32>
    %c0_8 = arith.constant 0 : index
    %c0_9 = arith.constant 0 : index
    %27 = vector.load %arg5[%c0_8, %c0_9] : memref<20x1xf32, #tpu.memory_space<vmem>>, vector<20x1xf32>
    %28 = vector.broadcast %27 : vector<20x1xf32> to vector<20x2048xf32>
    %29 = arith.addf %26, %28 : vector<20x2048xf32>
    %cst_10 = arith.constant 0.000000e+00 : f32
    %30 = vector.broadcast %cst_10 : f32 to vector<20x2048xf32>
    %31 = arith.maximumf %29, %30 : vector<20x2048xf32>
    %c0_11 = arith.constant 0 : index
    %c0_12 = arith.constant 0 : index
    %32 = vector.load %arg6[%c0_11, %c0_12] : memref<20x20xbf16, #tpu.memory_space<vmem>>, vector<20x20xbf16>
    %33 = arith.truncf %31 : vector<20x2048xf32> to vector<20x2048xbf16>
    %cst_13 = arith.constant dense<0.000000e+00> : vector<20x2048xf32>
    %34 = tpu.matmul %32, %33, %cst_13 {dimension_numbers = #tpu.dot_dimension_numbers<[1], [0], [0], [1], [0, 0, 1, 1], [], []>} : vector<20x20xbf16>, vector<20x2048xbf16>, vector<20x2048xf32> -> vector<20x2048xf32>
    %c0_14 = arith.constant 0 : index
    %c0_15 = arith.constant 0 : index
    %35 = vector.load %arg7[%c0_14, %c0_15] : memref<20x1xf32, #tpu.memory_space<vmem>>, vector<20x1xf32>
    %36 = vector.broadcast %35 : vector<20x1xf32> to vector<20x2048xf32>
    %37 = arith.addf %34, %36 : vector<20x2048xf32>
    %cst_16 = arith.constant 0.000000e+00 : f32
    %38 = vector.broadcast %cst_16 : f32 to vector<20x2048xf32>
    %39 = arith.maximumf %37, %38 : vector<20x2048xf32>
    %40 = vector.extract_strided_slice %39 {offsets = [0, 0], sizes = [20, 128], strides = [1, 1]} : vector<20x2048xf32> to vector<20x128xf32>
    %41 = vector.extract_strided_slice %39 {offsets = [0, 128], sizes = [20, 128], strides = [1, 1]} : vector<20x2048xf32> to vector<20x128xf32>
    %42 = vector.extract_strided_slice %39 {offsets = [0, 256], sizes = [20, 128], strides = [1, 1]} : vector<20x2048xf32> to vector<20x128xf32>
    %43 = vector.extract_strided_slice %39 {offsets = [0, 384], sizes = [20, 128], strides = [1, 1]} : vector<20x2048xf32> to vector<20x128xf32>
    %44 = vector.extract_strided_slice %39 {offsets = [0, 512], sizes = [20, 128], strides = [1, 1]} : vector<20x2048xf32> to vector<20x128xf32>
    %45 = vector.extract_strided_slice %39 {offsets = [0, 640], sizes = [20, 128], strides = [1, 1]} : vector<20x2048xf32> to vector<20x128xf32>
    %46 = vector.extract_strided_slice %39 {offsets = [0, 768], sizes = [20, 128], strides = [1, 1]} : vector<20x2048xf32> to vector<20x128xf32>
    %47 = vector.extract_strided_slice %39 {offsets = [0, 896], sizes = [20, 128], strides = [1, 1]} : vector<20x2048xf32> to vector<20x128xf32>
    %48 = vector.extract_strided_slice %39 {offsets = [0, 1024], sizes = [20, 128], strides = [1, 1]} : vector<20x2048xf32> to vector<20x128xf32>
    %49 = vector.extract_strided_slice %39 {offsets = [0, 1152], sizes = [20, 128], strides = [1, 1]} : vector<20x2048xf32> to vector<20x128xf32>
    %50 = vector.extract_strided_slice %39 {offsets = [0, 1280], sizes = [20, 128], strides = [1, 1]} : vector<20x2048xf32> to vector<20x128xf32>
    %51 = vector.extract_strided_slice %39 {offsets = [0, 1408], sizes = [20, 128], strides = [1, 1]} : vector<20x2048xf32> to vector<20x128xf32>
    %52 = vector.extract_strided_slice %39 {offsets = [0, 1536], sizes = [20, 128], strides = [1, 1]} : vector<20x2048xf32> to vector<20x128xf32>
    %53 = vector.extract_strided_slice %39 {offsets = [0, 1664], sizes = [20, 128], strides = [1, 1]} : vector<20x2048xf32> to vector<20x128xf32>
    %54 = vector.extract_strided_slice %39 {offsets = [0, 1792], sizes = [20, 128], strides = [1, 1]} : vector<20x2048xf32> to vector<20x128xf32>
    %55 = vector.extract_strided_slice %39 {offsets = [0, 1920], sizes = [20, 128], strides = [1, 1]} : vector<20x2048xf32> to vector<20x128xf32>
    %56 = arith.addf %40, %41 : vector<20x128xf32>
    %57 = arith.addf %42, %43 : vector<20x128xf32>
    %58 = arith.addf %44, %45 : vector<20x128xf32>
    %59 = arith.addf %46, %47 : vector<20x128xf32>
    %60 = arith.addf %48, %49 : vector<20x128xf32>
    %61 = arith.addf %50, %51 : vector<20x128xf32>
    %62 = arith.addf %52, %53 : vector<20x128xf32>
    %63 = arith.addf %54, %55 : vector<20x128xf32>
    %64 = arith.addf %56, %57 : vector<20x128xf32>
    %65 = arith.addf %58, %59 : vector<20x128xf32>
    %66 = arith.addf %60, %61 : vector<20x128xf32>
    %67 = arith.addf %62, %63 : vector<20x128xf32>
    %68 = arith.addf %64, %65 : vector<20x128xf32>
    %69 = arith.addf %66, %67 : vector<20x128xf32>
    %70 = arith.addf %68, %69 : vector<20x128xf32>
    %c0_17 = arith.constant 0 : index
    %c0_18 = arith.constant 0 : index
    %71 = vector.load %arg8[%c0_17, %c0_18] : memref<1x20xf32, #tpu.memory_space<vmem>>, vector<1x20xf32>
    %cst_19 = arith.constant dense<0.000000e+00> : vector<1x128xf32>
    %72 = tpu.matmul %71, %70, %cst_19 {dimension_numbers = #tpu.dot_dimension_numbers<[1], [0], [0], [1], [0, 0, 1, 1], [], []>} : vector<1x20xf32>, vector<20x128xf32>, vector<1x128xf32> -> vector<1x128xf32>
    %c0_20 = arith.constant 0 : index
    %c0_21 = arith.constant 0 : index
    %73 = vector.load %arg9[%c0_20, %c0_21] : memref<1x128xf32, #tpu.memory_space<vmem>>, vector<1x128xf32>
    tpu.vector_store %arg9[%c0_20, %c0_21], %72 {strides = array<i32>} : memref<1x128xf32, #tpu.memory_space<vmem>>, vector<1x128xf32>,
    return
  }
  func.func @transform_0(%arg0: i32) -> (i32, i32) {
    %c0_i32 = arith.constant 0 : i32
    %c0_i32_0 = arith.constant 0 : i32
    return %c0_i32, %arg0 : i32, i32
  }
  func.func @transform_1(%arg0: i32) -> (i32, i32) {
    %c0_i32 = arith.constant 0 : i32
    %c0_i32_0 = arith.constant 0 : i32
    %c0_i32_1 = arith.constant 0 : i32
    return %c0_i32, %c0_i32_0 : i32, i32
  }
  func.func @transform_2(%arg0: i32) -> (i32, i32) {
    %c0_i32 = arith.constant 0 : i32
    %c0_i32_0 = arith.constant 0 : i32
    %c0_i32_1 = arith.constant 0 : i32
    return %c0_i32, %c0_i32_0 : i32, i32
  }
  func.func @transform_3(%arg0: i32) -> (i32, i32) {
    %c0_i32 = arith.constant 0 : i32
    %c0_i32_0 = arith.constant 0 : i32
    %c0_i32_1 = arith.constant 0 : i32
    return %c0_i32, %c0_i32_0 : i32, i32
  }
  func.func @transform_4(%arg0: i32) -> (i32, i32) {
    %c0_i32 = arith.constant 0 : i32
    %c0_i32_0 = arith.constant 0 : i32
    %c0_i32_1 = arith.constant 0 : i32
    return %c0_i32, %c0_i32_0 : i32, i32
  }
  func.func @transform_5(%arg0: i32) -> (i32, i32) {
    %c0_i32 = arith.constant 0 : i32
    %c0_i32_0 = arith.constant 0 : i32
    %c0_i32_1 = arith.constant 0 : i32
    return %c0_i32, %c0_i32_0 : i32, i32
  }
  func.func @transform_6(%arg0: i32) -> (i32, i32) {
    %c0_i32 = arith.constant 0 : i32
    %c0_i32_0 = arith.constant 0 : i32
    %c0_i32_1 = arith.constant 0 : i32
    return %c0_i32, %c0_i32_0 : i32, i32
  }
  func.func @transform_7(%arg0: i32) -> (i32, i32) {
    %c0_i32 = arith.constant 0 : i32
    %c0_i32_0 = arith.constant 0 : i32
    %c0_i32_1 = arith.constant 0 : i32
    return %c0_i32, %c0_i32_0 : i32, i32
  }
  func.func @transform_8(%arg0: i32) -> (i32, i32) {
    %c0_i32 = arith.constant 0 : i32
    %c0_i32_0 = arith.constant 0 : i32
    return %c0_i32, %arg0 : i32, i32
  }
}

</mosaic_0001>

<bundles_post_ra>
// kernel: tpu_custom_call.1
= control target key start
LH: loop header
LB: loop body
LE: loop exit
PB: predicated region body
PF: predicated region fallthrough
CT: control target
= control target key end

     0   :  { %v1782_v2 = vmov 1   ;;  %s2949_s0 = inlined_call_operand.vmem [shape: f32[3,2048], index: 0, kind: input, shape index: {}]   ;;  %s2950_s1 = inlined_call_operand.vmem [shape: f32[32,3], index: 1, kind: input, shape index: {}]   ;;  %s2951_s2 = inlined_call_operand.vmem [shape: f32[32,1], index: 2, kind: input, shape index: {}]   ;;  %s2952_s3 = inlined_call_operand.vmem [shape: bf16[20,32], index: 3, kind: input, shape index: {}]   ;;  %s2953_s4 = inlined_call_operand.vmem [shape: f32[20,1], index: 4, kind: input, shape index: {}]   ;;  %s2954_s5 = inlined_call_operand.vmem [shape: bf16[20,20], index: 5, kind: input, shape index: {}]   ;;  %s2955_s6 = inlined_call_operand.vmem [shape: f32[20,1], index: 6, kind: input, shape index: {}]   ;;  %s2956_s7 = inlined_call_operand.vmem [shape: f32[1,20], index: 7, kind: input, shape index: {}]   ;;  %s2957_s8 = inlined_call_operand.hbm [shape: f32[1,128], index: 8, kind: output, shape index: {}]  }
   0x1   :  { %v41_v0 = vld [vmem:[%s2950_s1 + $0x10] sm:$0xff]  ;;  %v40_v1 = vld [vmem:[%s2950_s1 + $0x8] sm:$0xff]  ;;  %1750 = vset.pattern.permute.xlu0 %v1782_v2  ;;  %1746 = vset.pattern.permute.xlu1 %v1782_v2 }
   0x2   :  { %13 = vsyncpa [#allocation3], 0  ;;  %192 = vperm.xlu1 %1746, %v41_v0   ;;  %188 = vperm.xlu0 %1750, %v40_v1   ;;  %v1783_v3 = vmov 2   ;;  %v42_v4 = vld [vmem:[%s2950_s1 + $0x18] sm:$0xff]  ;;  %v1784_v5 = vmov 0   ;;  %v39_v6 = vld [vmem:[%s2950_s1] sm:$0xff] }
   0x3   :  { %1747 = vset.pattern.permute.xlu2 %v1783_v3  ;;  %v567_v7 = vld [vmem:[%s2951_s2] sm:$0xff]  ;;  %v569_v8 = vld [vmem:[%s2951_s2 + $0x10] sm:$0xff]  ;;  %v570_v9 = vld [vmem:[%s2951_s2 + $0x18] sm:$0xff]  ;;  %vm780_vm0 = vcmask 261120   ;;  %vm1191_vm1 = vcmask 1041408   ;;  %vm1184_vm2 = vcmask 162816  }
   0x4   :  { %384 = vperm.xlu2 %1747, %v41_v0   ;;  %v1160_v10 = vld [vmem:[%s2955_s6 + $0x10] sm:$0xf]  ;;  %v568_v11 = vld [vmem:[%s2951_s2 + $0x8] sm:$0xff]  ;;  %v754_v13 = vld [vmem:[%s2953_s4] sm:$0xff]  ;;  %vm1625_vm3 = vcmask 1043456   ;;  %s1785_s29 = smov [#allocation2]  }
   0x5   :  { %v756_v12 = vld [vmem:[%s2953_s4 + $0x10] sm:$0xf]  ;;  %v755_v14 = vld [vmem:[%s2953_s4 + $0x8] sm:$0xff]  ;;  %v1158_v16 = vld [vmem:[%s2955_s6] sm:$0xff]  ;;  %s1655_s2 = sshll.u32 %s1785_s29, 4  ;;  %s1657_s10 = sshll.u32 %s2957_s8, 4  ;;  %s1656_s2 = int_to_ptr.vmem [resolvable:$true] %s1655_s2  ;;  %s1658_s10 = int_to_ptr.hbm [resolvable:$true] %s1657_s10 }
   0x6   :  { %v1159_v15 = vld [vmem:[%s2955_s6 + $0x8] sm:$0xff]  ;;  %v31_v18 = vld [vmem:[%s2949_s0] sm:$0x77]  ;;  %v33_v26 = vld [vmem:[%s2949_s0 + $0x10] sm:$0x77] }
   0x7   :  { %v32_v19 = vld [vmem:[%s2949_s0 + $0x8] sm:$0x77]  ;;  %v199_v20 = vperm.slane %v31_v18, 1  ;;  %v200_v21 = vperm.slane %v31_v18, 5  ;;  %v391_v25 = vperm.slane %v31_v18, 2  ;;  %v392_v27 = vperm.slane %v31_v18, 6 }
   0x8   :  { %v201_v22 = vperm.slane %v32_v19, 1  ;;  %v202_v23 = vperm.slane %v32_v19, 5  ;;  %v393_v30 = vperm.slane %v32_v19, 2  ;;  %v394_v33 = vperm.slane %v32_v19, 6  ;;  %v34_v39 = vld [vmem:[%s2949_s0 + $0x18] sm:$0x77] }
   0x9   :  { %v1886_v28 = vperm.slane %v199_v20, 1  ;;  %v1888_v29 = vperm.slane %v200_v21, 1  ;;  %v203_v34 = vperm.slane %v33_v26, 1  ;;  %v71_v35 = vperm.slane %v31_v18, 0 }
   0xa   :  { %196 = vperm.xlu1 %1746, %v42_v4   ;;  %1751 = vset.pattern.permute.xlu0 %v1784_v5  ;;  %v1890_v31 = vperm.slane %v201_v22, 1  ;;  %v1892_v32 = vperm.slane %v202_v23, 1  ;;  %v1894_v36 = vperm.slane %v391_v25, 2  ;;  %v72_v37 = vperm.slane %v31_v18, 4 }
   0xb   :  { %55 = vperm.xlu0 %1751, %v41_v0   ;;  %v73_v38 = vperm.slane %v32_v19, 0  ;;  %v1899_v40 = vperm.slane %v392_v27, 2  ;;  %v395_v41 = vperm.slane %v33_v26, 2  ;;  %v396_v42 = vperm.slane %v33_v26, 6 }
   0xc   :  { %388 = vperm.xlu2 %1747, %v42_v4   ;;  %2987 = vst [vmem:[#allocation7_spill] sm:$0xff] %v1894_v36  ;;  %v397_v43 = vperm.slane %v34_v39, 2  ;;  %v1901_v44 = vperm.slane %v393_v30, 2  ;;  %v74_v45 = vperm.slane %v32_v19, 4  ;;  %v204_v46 = vperm.slane %v33_v26, 5 }
   0xd   :  { %2988 = vst [vmem:[#allocation8_spill] sm:$0xff] %v1899_v40  ;;  %v398_v47 = vperm.slane %v34_v39, 6  ;;  %v1903_v48 = vperm.slane %v394_v33, 2  ;;  %v75_v49 = vperm.slane %v33_v26, 0  ;;  %v1905_v50 = vperm.slane %v203_v34, 1 }
   0xe   :  { %2989 = vst [vmem:[#allocation9_spill] sm:$0xff] %v1901_v44  ;;  %v205_v51 = vperm.slane %v34_v39, 1  ;;  %v1907_v52 = vperm.slane %v71_v35, 0  ;;  %v1909_v53 = vperm.slane %v72_v37, 0  ;;  %v1911_v54 = vperm.slane %v73_v38, 0 }
   0xf   :  { %2990 = vst [vmem:[#allocation10_spill] sm:$0xff] %v1903_v48  ;;  %v206_v55 = vperm.slane %v34_v39, 5  ;;  %v1913_v56 = vperm.slane %v395_v41, 2  ;;  %v76_v57 = vperm.slane %v33_v26, 4  ;;  %v1915_v58 = vperm.slane %v396_v42, 2 }
  0x10   :  { %v1917_v59 = vperm.slane %v397_v43, 2  ;;  %v1921_v61 = vperm.slane %v74_v45, 0  ;;  %v1923_v62 = vperm.slane %v204_v46, 1  ;;  %v77_v63 = vperm.slane %v34_v39, 0 }
  0x11   :  { %v1925_v0 = vperm.slane %v398_v47, 2 }
  0x12   :  { %1748 = vset.pattern.permute.xlu1 %v1784_v5  ;;  %2991 = vst [vmem:[#allocation11_spill] sm:$0xff] %v1917_v59  ;;  %v1975_v18 = vperm.slane %v77_v63, 0 }
  0x13   :  { %60 = vperm.xlu0 %1751, %v42_v4   ;;  %50 = vperm.xlu1 %1748, %v40_v1   ;;  %2992 = vst [vmem:[#allocation12_spill] sm:$0xff] %v1925_v0  ;;  %v1937_v4 = vperm.slane %v205_v51, 1 }
  0x14   :  { %1749 = vset.pattern.permute.xlu2 %v1782_v2 }
  0x15   :  { %184 = vperm.xlu2 %1749, %v39_v6   ;;  %2994 = vst [vmem:[#allocation14_spill] sm:$0xff] %v1937_v4 }
  0x1b   :  { %1752 = vset.pattern.permute.xlu1 %v1783_v3  ;;  %45 = vperm.xlu0 %1751, %v39_v6  }
  0x1c   :  { %376 = vperm.xlu1 %1752, %v39_v6  }
  0x1d   :  { %1753 = vset.pattern.permute.xlu2 %v1783_v3  ;;  %v1935_v3 = vperm.slane %v75_v49, 0 }
  0x1e   :  { %380 = vperm.xlu2 %1753, %v40_v1  }
  0x1f   :  { %2993 = vst [vmem:[#allocation13_spill] sm:$0xff] %v1935_v3 }
  0x23   :  { %573 = vperm.xlu0 %1751, %v567_v7   ;;  %v78_v7 = vperm.slane %v34_v39, 4 }
  0x24   :  { %1754 = vset.pattern.permute.xlu1 %v1784_v5 }
  0x25   :  { %583 = vperm.xlu1 %1754, %v569_v8   ;;  %v1947_v8 = vperm.slane %v206_v55, 1  ;;  %v2005_v27 = vperm.slane %v78_v7, 0 }
  0x26   :  { %1755 = vset.pattern.permute.xlu2 %v1784_v5 }
  0x27   :  { %588 = vperm.xlu2 %1755, %v570_v9  }
  0x2b   :  { %1173 = vperm.xlu0 %1751, %v1160_v10  }
  0x2d   :  { %578 = vperm.xlu1 %1754, %v568_v11  }
  0x2f   :  { %769 = vperm.xlu2 %1755, %v756_v12   ;;  %v1957_v12 = vperm.slane %v76_v57, 0 }
  0x35   :  { %759 = vperm.xlu1 %1754, %v754_v13  }
  0x37   :  { %764 = vperm.xlu2 %1755, %v755_v14  }
  0x3d   :  { %1168 = vperm.xlu1 %1754, %v1159_v15  }
  0x3f   :  { %1163 = vperm.xlu2 %1755, %v1158_v16  }
  0x5e   :  { %v1873_v17 = vpop.permute.xlu2 %384 }
  0x5f   :  { %2985 = vst [vmem:[#allocation5_spill] sm:$0xff] %v1873_v17  ;;  %v1929_v1 = vmul.f32 %v1894_v36, %v1873_v17  ;;  %v1933_v2 = vmul.f32 %v1899_v40, %v1873_v17  ;;  %v1941_v5 = vmul.f32 %v1901_v44, %v1873_v17  ;;  %v1945_v6 = vmul.f32 %v1903_v48, %v1873_v17 }
  0x60   :  { %v1955_v11 = vmul.f32 %v1913_v56, %v1873_v17  ;;  %v1961_v13 = vmul.f32 %v1915_v58, %v1873_v17  ;;  %v1965_v14 = vmul.f32 %v1917_v59, %v1873_v17  ;;  %v1979_v19 = vmul.f32 %v1925_v0, %v1873_v17 }
  0x62   :  { %2997 = vst [vmem:[#allocation17_spill] sm:$0xff] %v1979_v19 }
  0x66   :  { %v1881_v24 = vpop.permute.xlu2 %388 }
  0x67   :  { %2986 = vst [vmem:[#allocation6_spill] sm:$0xff] %v1881_v24  ;;  %v1969_v15 = vmul.f32 %v1894_v36, %v1881_v24  ;;  %v1973_v16 = vmul.f32 %v1899_v40, %v1881_v24  ;;  %v1983_v20 = vmul.f32 %v1901_v44, %v1881_v24  ;;  %v1987_v21 = vmul.f32 %v1903_v48, %v1881_v24 }
  0x68   :  { %v1991_v22 = vmul.f32 %v1913_v56, %v1881_v24  ;;  %v1995_v23 = vmul.f32 %v1915_v58, %v1881_v24  ;;  %v2003_v26 = vmul.f32 %v1917_v59, %v1881_v24  ;;  %v2009_v30 = vmul.f32 %v1925_v0, %v1881_v24 }
  0x6a   :  { %2998 = vst [vmem:[#allocation18_spill] sm:$0xff] %v1991_v22 }
  0x6b   :  { %2999 = vst [vmem:[#allocation19_spill] sm:$0xff] %v1995_v23 }
  0x6c   :  { %3001 = vst [vmem:[#allocation21_spill] sm:$0xff] %v2003_v26 }
  0x6d   :  { %3002 = vst [vmem:[#allocation22_spill] sm:$0xff] %v2009_v30 }
  0x6f   :  { %v1919_v60 = vpop.permute.xlu2 %184 }
  0x70   :  { %v1999_v25 = vmul.f32 %v1886_v28, %v1919_v60  ;;  %v2015_v34 = vmul.f32 %v1888_v29, %v1919_v60  ;;  %v2019_v35 = vmul.f32 %v1890_v31, %v1919_v60  ;;  %v2023_v37 = vmul.f32 %v1892_v32, %v1919_v60 }
  0x72   :  { %3000 = vst [vmem:[#allocation20_spill] sm:$0xff] %v1999_v25 }
  0x73   :  { %3003 = vst [vmem:[#allocation23_spill] sm:$0xff] %v2015_v34 }
  0x74   :  { %v1949_v9 = vpop.permute.xlu1 %192  ;;  %v1951_v10 = vpop.permute.xlu0 %188  ;;  %3004 = vst [vmem:[#allocation24_spill] sm:$0xff] %v2019_v35 }
  0x75   :  { %2995 = vst [vmem:[#allocation15_spill] sm:$0xff] %v1949_v9  ;;  %v279_v33 = vmul.f32 %v1886_v28, %v1949_v9  ;;  %v280_v38 = vmul.f32 %v1888_v29, %v1949_v9  ;;  %v281_v39 = vmul.f32 %v1890_v31, %v1949_v9  ;;  %v282_v41 = vmul.f32 %v1892_v32, %v1949_v9 }
  0x76   :  { %2996 = vst [vmem:[#allocation16_spill] sm:$0xff] %v1951_v10  ;;  %v2033_v42 = vmul.f32 %v1886_v28, %v1951_v10  ;;  %v2037_v43 = vmul.f32 %v1888_v29, %v1951_v10  ;;  %v2041_v45 = vmul.f32 %v1890_v31, %v1951_v10  ;;  %v2045_v46 = vmul.f32 %v1892_v32, %v1951_v10 }
  0x77   :  { %3005 = vst [vmem:[#allocation25_spill] sm:$0xff] %v2023_v37  ;;  %v283_v47 = vmul.f32 %v1905_v50, %v1949_v9  ;;  %v284_v51 = vmul.f32 %v1923_v62, %v1949_v9  ;;  %v285_v55 = vmul.f32 %v1937_v4, %v1949_v9  ;;  %v286_v57 = vmul.f32 %v1947_v8, %v1949_v9 }
  0x78   :  { %v2049_v49 = vpop.permute.xlu2 %380  ;;  %v2059_v63 = vmul.f32 %v1905_v50, %v1951_v10  ;;  %v2089_v26 = vmul.f32 %v1923_v62, %v1951_v10 }
  0x79   :  { %3006 = vst [vmem:[#allocation26_spill] sm:$0xff] %v2049_v49  ;;  %v2065_v24 = vmul.f32 %v1894_v36, %v2049_v49  ;;  %v2069_v17 = vmul.f32 %v1899_v40, %v2049_v49  ;;  %v2073_v0 = vmul.f32 %v1901_v44, %v2049_v49  ;;  %v2077_v9 = vmul.f32 %v1903_v48, %v2049_v49 }
  0x7a   :  { %3007 = vst [vmem:[#allocation27_spill] sm:$0xff] %v2059_v63 }
  0x7b   :  { %3009 = vst [vmem:[#allocation29_spill] sm:$0xff] %v2077_v9 }
  0x7c   :  { %v2061_v7 = vpop.permute.xlu1 %196  ;;  %3011 = vst [vmem:[#allocation31_spill] sm:$0xff] %v2089_v26 }
  0x7d   :  { %3008 = vst [vmem:[#allocation28_spill] sm:$0xff] %v2061_v7  ;;  %v2079_v59 = vpop.permute.xlu0 %55  ;;  %v295_v63 = vmul.f32 %v1886_v28, %v2061_v7  ;;  %v296_v30 = vmul.f32 %v1888_v29, %v2061_v7  ;;  %v297_v19 = vmul.f32 %v1890_v31, %v2061_v7  ;;  %v298_v29 = vmul.f32 %v1892_v32, %v2061_v7 }
  0x7e   :  { %3010 = vst [vmem:[#allocation30_spill] sm:$0xff] %v2079_v59  ;;  %v151_v23 = vmul.f32 %v1907_v52, %v2079_v59  ;;  %v152_v22 = vmul.f32 %v1909_v53, %v2079_v59  ;;  %v153_v37 = vmul.f32 %v1911_v54, %v2079_v59  ;;  %v154_v28 = vmul.f32 %v1921_v61, %v2079_v59 }
  0x7f   :  { %v155_v31 = vmul.f32 %v1935_v3, %v2079_v59  ;;  %v2105_v26 = vmul.f32 %v1905_v50, %v2061_v7  ;;  %v156_v35 = vmul.f32 %v1957_v12, %v2079_v59  ;;  %v2111_v36 = vmul.f32 %v1923_v62, %v2061_v7 }
  0x80   :  { %v343_v34 = vadd.f32 %v279_v33, %v151_v23  ;;  %v344_v25 = vadd.f32 %v280_v38, %v152_v22  ;;  %v345_v48 = vadd.f32 %v281_v39, %v153_v37  ;;  %v346_v44 = vadd.f32 %v282_v41, %v154_v28 }
  0x81   :  { %3012 = vst [vmem:[#allocation32_spill] sm:$0xff] %v2105_v26  ;;  %v347_v40 = vadd.f32 %v283_v47, %v155_v31  ;;  %v348_v32 = vadd.f32 %v284_v51, %v156_v35  ;;  %v157_v3 = vmul.f32 %v1975_v18, %v2079_v59  ;;  %v2126_v22 = vmul.f32 %v1937_v4, %v2061_v7 }
  0x82   :  { %v2116_v9 = vadd.f32 %v1929_v1, %v343_v34  ;;  %v2119_v26 = vadd.f32 %v1933_v2, %v344_v25  ;;  %v2122_v23 = vadd.f32 %v1941_v5, %v345_v48  ;;  %v2129_v33 = vadd.f32 %v1945_v6, %v346_v44 }
  0x83   :  { %v2132_v35 = vadd.f32 %v1955_v11, %v347_v40  ;;  %v349_v37 = vadd.f32 %v285_v55, %v157_v3  ;;  %v158_v1 = vmul.f32 %v2005_v27, %v2079_v59  ;;  %v2137_v2 = vadd.f32 %v1961_v13, %v348_v32 }
  0x84   :  { %v2141_v48 = vmul.f32 %v1947_v8, %v2061_v7  ;;  %v2145_v5 = vmul.f32 %v1905_v50, %v1919_v60  ;;  %v2149_v44 = vmul.f32 %v1913_v56, %v2049_v49  ;;  %v2162_v13 = vmul.f32 %v1915_v58, %v2049_v49 }
  0x85   :  { %v2151_v40 = vpop.permute.xlu0 %60  ;;  %v2153_v3 = vpop.permute.xlu1 %50  ;;  %v2156_v6 = vadd.f32 %v1965_v14, %v349_v37  ;;  %v2158_v11 = vadd.f32 %v286_v57, %v158_v1  ;;  %v2166_v50 = vmul.f32 %v1937_v4, %v1951_v10 }
  0x86   :  { %3013 = vst [vmem:[#allocation33_spill] sm:$0xff] %v2151_v40  ;;  %v167_v25 = vmul.f32 %v1907_v52, %v2151_v40  ;;  %v168_v34 = vmul.f32 %v1909_v53, %v2151_v40  ;;  %v169_v14 = vmul.f32 %v1911_v54, %v2151_v40  ;;  %v170_v38 = vmul.f32 %v1921_v61, %v2151_v40 }
  0x87   :  { %3014 = vst [vmem:[#allocation34_spill] sm:$0xff] %v2166_v50  ;;  %v135_v39 = vmul.f32 %v1907_v52, %v2153_v3  ;;  %v136_v41 = vmul.f32 %v1909_v53, %v2153_v3  ;;  %v137_v47 = vmul.f32 %v1911_v54, %v2153_v3  ;;  %v138_v51 = vmul.f32 %v1921_v61, %v2153_v3 }
  0x88   :  { %v359_v55 = vadd.f32 %v295_v63, %v167_v25  ;;  %v360_v57 = vadd.f32 %v296_v30, %v168_v34  ;;  %v361_v28 = vadd.f32 %v297_v19, %v169_v14  ;;  %v362_v31 = vadd.f32 %v298_v29, %v170_v38  ;;  %v2192_v63 = vpop.permute.xlu2 %588  ;;  %v3018_v14 = vld [vmem:[#allocation7_spill] sm:$0xff] }
  0x89   :  { %v327_v32 = vadd.f32 %v2033_v42, %v135_v39  ;;  %v328_v37 = vadd.f32 %v2037_v43, %v136_v41  ;;  %v329_v1 = vadd.f32 %v2041_v45, %v137_v47  ;;  %v330_v7 = vadd.f32 %v2045_v46, %v138_v51  ;;  %v3017_v45 = vld [vmem:[#allocation13_spill] sm:$0xff]  ;;  %v3019_v41 = vld [vmem:[#allocation8_spill] sm:$0xff] }
  0x8a   :  { %v551_v59 = vadd.f32 %v1969_v15, %v359_v55  ;;  %v552_v49 = vadd.f32 %v1973_v16, %v360_v57  ;;  %v553_v50 = vadd.f32 %v1983_v20, %v361_v28  ;;  %v554_v4 = vadd.f32 %v1987_v21, %v362_v31  ;;  %v3020_v55 = vld [vmem:[#allocation9_spill] sm:$0xff] }
  0x8b   :  { %v2195_v19 = vadd.f32 %v2065_v24, %v327_v32  ;;  %v2198_v30 = vadd.f32 %v2069_v17, %v328_v37  ;;  %v2201_v42 = vadd.f32 %v2073_v0, %v329_v1  ;;  %v2205_v15 = vmul.f32 %v1947_v8, %v1951_v10  ;;  %v3016_v24 = vld [vmem:[#allocation29_spill] sm:$0xff]  ;;  %v3022_v32 = vld [vmem:[#allocation20_spill] sm:$0xff]  ;;  %v3023_v1 = vld [vmem:[#allocation23_spill] sm:$0xff] }
  0x8c   :  { %v2208_v16 = vadd.f32 %v2192_v63, %v551_v59  ;;  %v2211_v20 = vadd.f32 %v2192_v63, %v552_v49  ;;  %v2214_v21 = vadd.f32 %v2192_v63, %v553_v50  ;;  %v2217_v43 = vadd.f32 %v3016_v24, %v330_v7  ;;  %v3025_v24 = vld [vmem:[#allocation24_spill] sm:$0xff] }
  0x8d   :  { %3015 = vst [vmem:[#allocation35_spill] sm:$0xff] %v2205_v15  ;;  %v2219_v17 = vpop.permute.xlu0 %45  ;;  %v2222_v0 = vadd.f32 %v2192_v63, %v554_v4  ;;  %v171_v46 = vmul.f32 %v3017_v45, %v2151_v40  ;;  %v172_v59 = vmul.f32 %v1957_v12, %v2151_v40  ;;  %v173_v49 = vmul.f32 %v1975_v18, %v2151_v40 }
  0x8e   :  { %v2230_v29 = vpop.permute.xlu1 %376  ;;  %v703_v50 = vmax.f32 %v2208_v16, 0.0  ;;  %v704_v7 = vmax.f32 %v2211_v20, 0.0  ;;  %v705_v25 = vmax.f32 %v2214_v21, 0.0  ;;  %v174_v4 = vmul.f32 %v2005_v27, %v2151_v40 }
  0x8f   :  { %v119_v34 = vmul.f32 %v1907_v52, %v2219_v17  ;;  %v439_v38 = vmul.f32 %v3018_v14, %v2230_v29  ;;  %v120_v39 = vmul.f32 %v1909_v53, %v2219_v17  ;;  %v440_v47 = vmul.f32 %v3019_v41, %v2230_v29  ;;  %v3021_v52 = vld [vmem:[#allocation10_spill] sm:$0xff]  ;;  %v3024_v53 = vld [vmem:[#allocation32_spill] sm:$0xff] }
  0x90   :  { %v121_v51 = vmul.f32 %v1911_v54, %v2219_v17  ;;  %v441_v57 = vmul.f32 %v3020_v55, %v2230_v29  ;;  %v122_v28 = vmul.f32 %v1921_v61, %v2219_v17  ;;  %v442_v31 = vmul.f32 %v3021_v52, %v2230_v29  ;;  %v3026_v54 = vld [vmem:[#allocation25_spill] sm:$0xff]  ;;  %v3027_v52 = vld [vmem:[#allocation18_spill] sm:$0xff] }
  0x91   :  { %v311_v37 = vadd.f32 %v3022_v32, %v119_v34  ;;  %v312_v16 = vadd.f32 %v3023_v1, %v120_v39  ;;  %v363_v20 = vadd.f32 %v3024_v53, %v171_v46  ;;  %v364_v21 = vadd.f32 %v2111_v36, %v172_v59  ;;  %v3028_v34 = vld [vmem:[#allocation19_spill] sm:$0xff]  ;;  %v3029_v53 = vld [vmem:[#allocation21_spill] sm:$0xff] }
  0x92   :  { %v313_v14 = vadd.f32 %v3025_v24, %v121_v51  ;;  %v314_v41 = vadd.f32 %v3026_v54, %v122_v28  ;;  %v365_v55 = vadd.f32 %v2126_v22, %v173_v49  ;;  %v366_v10 = vadd.f32 %v2141_v48, %v174_v4  ;;  %v3030_v48 = vld [vmem:[#allocation17_spill] sm:$0xff] }
  0x93   :  { %v706_v61 = vmax.f32 %v2222_v0, 0.0  ;;  %v503_v40 = vadd.f32 %v439_v38, %v311_v37  ;;  %v555_v15 = vadd.f32 %v3027_v52, %v363_v20  ;;  %v556_v32 = vadd.f32 %v3028_v34, %v364_v21  ;;  %v3031_v0 = vld [vmem:[#allocation22_spill] sm:$0xff] }
  0x94   :  { %v504_v39 = vadd.f32 %v440_v47, %v312_v16  ;;  %v505_v1 = vadd.f32 %v441_v57, %v313_v14  ;;  %v506_v46 = vadd.f32 %v442_v31, %v314_v41  ;;  %v557_v36 = vadd.f32 %v3029_v53, %v365_v55 }
  0x95   :  { %v2265_v59 = vpop.permute.xlu0 %573  ;;  %v643_v51 = vadd.f32 %v2192_v63, %v555_v15  ;;  %v644_v22 = vadd.f32 %v2192_v63, %v556_v32  ;;  %v542_v49 = vadd.f32 %v3030_v48, %v2158_v11  ;;  %v558_v4 = vadd.f32 %v3031_v0, %v366_v10 }
  0x96   :  { %v2273_v38 = vadd.f32 %v2265_v59, %v503_v40  ;;  %v2276_v47 = vadd.f32 %v2265_v59, %v504_v39  ;;  %v2279_v57 = vadd.f32 %v2265_v59, %v505_v1  ;;  %v2282_v28 = vadd.f32 %v2265_v59, %v506_v46 }
  0x97   :  { %v2284_v15 = vpop.permute.xlu1 %583  ;;  %v707_v31 = vmax.f32 %v643_v51, 0.0  ;;  %v708_v37 = vmax.f32 %v644_v22, 0.0  ;;  %v645_v11 = vadd.f32 %v2192_v63, %v557_v36  ;;  %v646_v10 = vadd.f32 %v2192_v63, %v558_v4 }
  0x98   :  { %v623_v40 = vadd.f32 %v2284_v15, %v2116_v9  ;;  %v624_v16 = vadd.f32 %v2284_v15, %v2119_v26  ;;  %v625_v20 = vadd.f32 %v2284_v15, %v2122_v23  ;;  %v626_v21 = vadd.f32 %v2284_v15, %v2129_v33 }
  0x99   :  { %v655_v24 = vmax.f32 %v2273_v38, 0.0  ;;  %v656_v14 = vmax.f32 %v2276_v47, 0.0  ;;  %v657_v54 = vmax.f32 %v2279_v57, 0.0  ;;  %v658_v41 = vmax.f32 %v2282_v28, 0.0  ;;  %v3032_v28 = vld [vmem:[#allocation27_spill] sm:$0xff] }
  0x9a   :  { %v687_v55 = vmax.f32 %v623_v40, 0.0  ;;  %v688_v52 = vmax.f32 %v624_v16, 0.0  ;;  %v689_v9 = vmax.f32 %v625_v20, 0.0  ;;  %v690_v34 = vmax.f32 %v626_v21, 0.0 }
  0x9b   :  { %v627_v26 = vadd.f32 %v2284_v15, %v2132_v35  ;;  %v628_v23 = vadd.f32 %v2284_v15, %v2137_v2  ;;  %v629_v33 = vadd.f32 %v2284_v15, %v2156_v6  ;;  %v709_v32 = vmax.f32 %v645_v11, 0.0 }
  0x9c   :  { %v738_v39 = vpack.c.bf16 %v703_v50, %v687_v55  ;;  %v739_v1 = vpack.c.bf16 %v704_v7, %v688_v52  ;;  %v740_v46 = vpack.c.bf16 %v705_v25, %v689_v9  ;;  %v741_v53 = vpack.c.bf16 %v706_v61, %v690_v34 }
  0x9d   :  { %v691_v36 = vmax.f32 %v627_v26, 0.0  ;;  %v692_v51 = vmax.f32 %v628_v23, 0.0  ;;  %v693_v22 = vmax.f32 %v629_v33, 0.0  ;;  %v630_v48 = vadd.f32 %v2284_v15, %v542_v49  ;;  %v3033_v26 = vld [vmem:[#allocation31_spill] sm:$0xff] }
  0x9e   :  { %793 = vmatpush.bf16.msra.mxu0 %v738_v39  ;;  %811 = vmatpush.bf16.msra.mxu1 %v739_v1  ;;  %v710_v0 = vmax.f32 %v646_v10, 0.0  ;;  %v123_v35 = vmul.f32 %v3017_v45, %v2219_v17  ;;  %v139_v2 = vmul.f32 %v3017_v45, %v2153_v3  ;;  %v443_v6 = vmul.f32 %v1913_v56, %v2230_v29  ;;  %v3034_v39 = vld [vmem:[#allocation14_spill] sm:$0xff] }
  0x9f   :  { %829 = vmatpush.bf16.msra.mxu2 %v740_v46  ;;  %847 = vmatpush.bf16.msra.mxu3 %v741_v53  ;;  %v2313_v50 = vpop.permute.xlu1 %578  ;;  %v742_v7 = vpack.c.bf16 %v707_v31, %v691_v36  ;;  %v743_v25 = vpack.c.bf16 %v708_v37, %v692_v51  ;;  %v744_v61 = vpack.c.bf16 %v709_v32, %v693_v22  ;;  %v694_v49 = vmax.f32 %v630_v48, 0.0  ;;  %v3035_v46 = vld [vmem:[#allocation34_spill] sm:$0xff]  ;;  %v3036_v36 = vld [vmem:[#allocation11_spill] sm:$0xff] }
  0xa0   :  { %v607_v4 = vadd.f32 %v2313_v50, %v2195_v19  ;;  %v608_v38 = vadd.f32 %v2313_v50, %v2198_v30  ;;  %v609_v45 = vadd.f32 %v2313_v50, %v2201_v42  ;;  %v610_v56 = vadd.f32 %v2313_v50, %v2217_v43 }
  0xa1   :  { %v745_v47 = vpack.c.bf16 %v710_v0, %v694_v49  ;;  %v315_v57 = vadd.f32 %v2145_v5, %v123_v35  ;;  %v331_v31 = vadd.f32 %v3032_v28, %v139_v2  ;;  %v124_v37 = vmul.f32 %v1957_v12, %v2219_v17  ;;  %v3037_v2 = vld [vmem:[#allocation26_spill] sm:$0xff] }
  0xa2   :  { %v671_v11 = vmax.f32 %v607_v4, 0.0  ;;  %v672_v10 = vmax.f32 %v608_v38, 0.0  ;;  %v673_v19 = vmax.f32 %v609_v45, 0.0  ;;  %v674_v40 = vmax.f32 %v610_v56, 0.0 }
  0xa3   :  { %v507_v16 = vadd.f32 %v443_v6, %v315_v57  ;;  %v523_v30 = vadd.f32 %v2149_v44, %v331_v31  ;;  %v140_v42 = vmul.f32 %v1957_v12, %v2153_v3  ;;  %v252_v43 = vmul.f32 %v1923_v62, %v1919_v60  ;;  %v2338_v44 = vld [vmem:[%s2949_s0 + $0x20] sm:$0x77] }
  0xa4   :  { %v722_v20 = vpack.c.bf16 %v671_v11, %v655_v24  ;;  %v723_v5 = vpack.c.bf16 %v672_v10, %v656_v14  ;;  %v724_v21 = vpack.c.bf16 %v673_v19, %v657_v54  ;;  %v725_v55 = vpack.c.bf16 %v674_v40, %v658_v41  ;;  %v2343_v62 = vld [vmem:[%s2952_s3] sm:$0xff]  ;;  %v3039_v11 = vld [vmem:[#allocation35_spill] sm:$0xff]  ;;  %v3040_v19 = vld [vmem:[#allocation30_spill] sm:$0xff] }
  0xa5   :  { %v595_v52 = vadd.f32 %v2265_v59, %v507_v16  ;;  %v611_v9 = vadd.f32 %v2313_v50, %v523_v30  ;;  %v316_v34 = vadd.f32 %v252_v43, %v124_v37  ;;  %v332_v23 = vadd.f32 %v3033_v26, %v140_v42  ;;  %v3041_v16 = vld [vmem:[#allocation33_spill] sm:$0xff] }
  0xa6   :  { %794 = vmatpush.bf16.msra.mxu0 %v722_v20  ;;  %812 = vmatpush.bf16.msra.mxu1 %v723_v5  ;;  %v444_v12 = vmul.f32 %v1915_v58, %v2230_v29  ;;  %v125_v24 = vmul.f32 %v1975_v18, %v2219_v17  ;;  %v141_v14 = vmul.f32 %v1975_v18, %v2153_v3  ;;  %v79_v54 = vperm.slane %v2338_v44, 0 }
  0xa7   :  { %830 = vmatpush.bf16.msra.mxu2 %v724_v21  ;;  %848 = vmatpush.bf16.msra.mxu3 %v725_v55  ;;  %v659_v41 = vmax.f32 %v595_v52, 0.0  ;;  %v675_v33 = vmax.f32 %v611_v9, 0.0  ;;  %v524_v32 = vadd.f32 %v2162_v13, %v332_v23  ;;  %v253_v1 = vmul.f32 %v3034_v39, %v1919_v60  ;;  %v3042_v52 = vld [vmem:[#allocation15_spill] sm:$0xff] }
  0xa8   :  { %v508_v58 = vadd.f32 %v444_v12, %v316_v34  ;;  %v333_v53 = vadd.f32 %v3035_v46, %v141_v14  ;;  %v445_v51 = vmul.f32 %v3036_v36, %v2230_v29  ;;  %v2358_v18 = vperm.slane %v79_v54, 0  ;;  %v3043_v34 = vld [vmem:[#allocation28_spill] sm:$0xff]  ;;  %v3044_v14 = vld [vmem:[#allocation5_spill] sm:$0xff] }
  0xa9   :  { %v726_v22 = vpack.c.bf16 %v675_v33, %v659_v41  ;;  %v612_v48 = vadd.f32 %v2313_v50, %v524_v32  ;;  %v317_v0 = vadd.f32 %v253_v1, %v125_v24  ;;  %v207_v13 = vperm.slane %v2338_v44, 1  ;;  %1670 = vmatmul.msk.bf16.vlgmr.msra.gmra.mxu0 %vm780_vm0, %v2343_v62  ;;  %1672 = vmatmul.msk.bf16.vlgmr.msra.gmra.mxu1 %vm780_vm0, %v2343_v62  ;;  %v3045_v41 = vld [vmem:[#allocation6_spill] sm:$0xff] }
  0xaa   :  { %865 = vmatpush.bf16.msrb.mxu0 %v742_v7  ;;  %883 = vmatpush.bf16.msrb.mxu1 %v743_v25  ;;  %v596_v35 = vadd.f32 %v2265_v59, %v508_v58  ;;  %v461_v6 = vmul.f32 %v3036_v36, %v3037_v2  ;;  %v126_v7 = vmul.f32 %v2005_v27, %v2219_v17  ;;  %v399_v25 = vperm.slane %v2338_v44, 2 }
  0xab   :  { %901 = vmatpush.bf16.msrb.mxu2 %v744_v61  ;;  %919 = vmatpush.bf16.msrb.mxu3 %v745_v47  ;;  %v676_v61 = vmax.f32 %v612_v48, 0.0  ;;  %v509_v49 = vadd.f32 %v445_v51, %v317_v0  ;;  %v142_v4 = vmul.f32 %v2005_v27, %v2153_v3  ;;  %v254_v38 = vmul.f32 %v1947_v8, %v1919_v60  ;;  %v3038_v47 = vld [vmem:[#allocation12_spill] sm:$0xff] }
  0xac   :  { %1674 = vmatmul.msk.bf16.vlgmr.msra.gmra.mxu2 %vm780_vm0, %v2343_v62  ;;  %1676 = vmatmul.msk.bf16.vlgmr.msra.gmra.mxu3 %vm780_vm0, %v2343_v62  ;;  %v660_v45 = vmax.f32 %v596_v35, 0.0  ;;  %v525_v56 = vadd.f32 %v461_v6, %v333_v53  ;;  %v446_v57 = vmul.f32 %v3038_v47, %v2230_v29  ;;  %v462_v28 = vmul.f32 %v3038_v47, %v3037_v2 }
  0xad   :  { %v597_v31 = vadd.f32 %v2265_v59, %v509_v49  ;;  %v318_v37 = vadd.f32 %v254_v38, %v126_v7  ;;  %v334_v10 = vadd.f32 %v3039_v11, %v142_v4  ;;  %v159_v27 = vmul.f32 %v2358_v18, %v3040_v19 }
  0xae   :  { %866 = vmatpush.bf16.msrb.mxu0 %v726_v22  ;;  %v727_v40 = vpack.c.bf16 %v676_v61, %v660_v45  ;;  %v613_v8 = vadd.f32 %v2313_v50, %v525_v56  ;;  %v175_v30 = vmul.f32 %v2358_v18, %v3041_v16  ;;  %v2391_v42 = vperm.slane %v207_v13, 1  ;;  %v36_v22 = vld [vmem:[%s2949_s0 + $0x28] sm:$0x77] }
  0xaf   :  { %v661_v43 = vmax.f32 %v597_v31, 0.0  ;;  %v510_v20 = vadd.f32 %v446_v57, %v318_v37  ;;  %v526_v5 = vadd.f32 %v462_v28, %v334_v10  ;;  %v2393_v21 = vperm.slane %v399_v25, 2 }
  0xb0   :  { %884 = vmatpush.bf16.msrb.mxu1 %v727_v40  ;;  %v677_v55 = vmax.f32 %v613_v8, 0.0  ;;  %v287_v9 = vmul.f32 %v2391_v42, %v3042_v52  ;;  %v303_v26 = vmul.f32 %v2391_v42, %v3043_v34  ;;  %v80_v23 = vperm.slane %v2338_v44, 4 }
  0xb1   :  { %v598_v12 = vadd.f32 %v2265_v59, %v510_v20  ;;  %v614_v24 = vadd.f32 %v2313_v50, %v526_v5  ;;  %v479_v54 = vmul.f32 %v2393_v21, %v3044_v14  ;;  %v495_v33 = vmul.f32 %v2393_v21, %v3045_v41 }
  0xb2   :  { %v728_v32 = vpack.c.bf16 %v677_v55, %v661_v43  ;;  %v351_v39 = vadd.f32 %v287_v9, %v159_v27  ;;  %v367_v1 = vadd.f32 %v303_v26, %v175_v30  ;;  %v2406_v58 = vperm.slane %v80_v23, 0 }
  0xb3   :  { %v662_v46 = vmax.f32 %v598_v12, 0.0  ;;  %v678_v53 = vmax.f32 %v614_v24, 0.0  ;;  %v208_v36 = vperm.slane %v2338_v44, 5  ;;  %v400_v51 = vperm.slane %v2338_v44, 6 }
  0xb4   :  { %902 = vmatpush.bf16.msrb.mxu2 %v728_v32  ;;  %v543_v48 = vadd.f32 %v479_v54, %v351_v39  ;;  %v559_v0 = vadd.f32 %v495_v33, %v367_v1  ;;  %v160_v13 = vmul.f32 %v2406_v58, %v3040_v19  ;;  %v176_v35 = vmul.f32 %v2406_v58, %v3041_v16 }
  0xb5   :  { %v729_v6 = vpack.c.bf16 %v678_v53, %v662_v46  ;;  %v2417_v7 = vperm.slane %v208_v36, 1  ;;  %v2419_v25 = vperm.slane %v400_v51, 2  ;;  %v81_v61 = vperm.slane %v36_v22, 0 }
  0xb6   :  { %v631_v44 = vadd.f32 %v2284_v15, %v543_v48  ;;  %v647_v49 = vadd.f32 %v2192_v63, %v559_v0  ;;  %v209_v4 = vperm.slane %v36_v22, 1  ;;  %v401_v38 = vperm.slane %v36_v22, 2 }
  0xb7   :  { %920 = vmatpush.bf16.msrb.mxu3 %v729_v6  ;;  %v288_v45 = vmul.f32 %v2417_v7, %v3042_v52  ;;  %v304_v56 = vmul.f32 %v2417_v7, %v3043_v34  ;;  %v480_v47 = vmul.f32 %v2419_v25, %v3044_v14  ;;  %v496_v57 = vmul.f32 %v2419_v25, %v3045_v41 }
  0xb8   :  { %v695_v28 = vmax.f32 %v631_v44, 0.0  ;;  %v711_v31 = vmax.f32 %v647_v49, 0.0  ;;  %v2431_v37 = vperm.slane %v81_v61, 0  ;;  %v2433_v11 = vperm.slane %v209_v4, 1 }
  0xb9   :  { %v352_v10 = vadd.f32 %v288_v45, %v160_v13  ;;  %v368_v27 = vadd.f32 %v304_v56, %v176_v35  ;;  %v2435_v40 = vperm.slane %v401_v38, 2  ;;  %v82_v8 = vperm.slane %v36_v22, 4 }
  0xba   :  { %v746_v30 = vpack.c.bf16 %v711_v31, %v695_v28  ;;  %v161_v43 = vmul.f32 %v2431_v37, %v3040_v19  ;;  %v177_v20 = vmul.f32 %v2431_v37, %v3041_v16  ;;  %v289_v5 = vmul.f32 %v2433_v11, %v3042_v52 }
  0xbb   :  { %v544_v55 = vadd.f32 %v480_v47, %v352_v10  ;;  %v560_v9 = vadd.f32 %v496_v57, %v368_v27  ;;  %v305_v26 = vmul.f32 %v2433_v11, %v3043_v34  ;;  %v481_v23 = vmul.f32 %v2435_v40, %v3044_v14 }
  0xbc   :  { %937 = vmatpush.bf16.msra.mxu0 %v746_v30  ;;  %v353_v12 = vadd.f32 %v289_v5, %v161_v43  ;;  %v497_v24 = vmul.f32 %v2435_v40, %v3045_v41  ;;  %v2449_v54 = vperm.slane %v82_v8, 0  ;;  %v210_v33 = vperm.slane %v36_v22, 5  ;;  %v3046_v8 = vld [vmem:[#allocation16_spill] sm:$0xff] }
  0xbd   :  { %v632_v32 = vadd.f32 %v2284_v15, %v544_v55  ;;  %v648_v39 = vadd.f32 %v2192_v63, %v560_v9  ;;  %v369_v1 = vadd.f32 %v305_v26, %v177_v20  ;;  %v402_v46 = vperm.slane %v36_v22, 6 }
  0xbe   :  { %v545_v53 = vadd.f32 %v481_v23, %v353_v12  ;;  %v162_v36 = vmul.f32 %v2449_v54, %v3040_v19  ;;  %v178_v51 = vmul.f32 %v2449_v54, %v3041_v16  ;;  %v2457_v48 = vperm.slane %v210_v33, 1 }
  0xbf   :  { %v696_v0 = vmax.f32 %v632_v32, 0.0  ;;  %v712_v13 = vmax.f32 %v648_v39, 0.0  ;;  %v561_v35 = vadd.f32 %v497_v24, %v369_v1  ;;  %v2459_v6 = vperm.slane %v402_v46, 2 }
  0xc0   :  { %v633_v61 = vadd.f32 %v2284_v15, %v545_v53  ;;  %v290_v44 = vmul.f32 %v2457_v48, %v3042_v52  ;;  %v306_v22 = vmul.f32 %v2457_v48, %v3043_v34  ;;  %v127_v49 = vmul.f32 %v2358_v18, %v2219_v17 }
  0xc1   :  { %v747_v4 = vpack.c.bf16 %v712_v13, %v696_v0  ;;  %v649_v38 = vadd.f32 %v2192_v63, %v561_v35  ;;  %v482_v45 = vmul.f32 %v2459_v6, %v3044_v14  ;;  %v498_v56 = vmul.f32 %v2459_v6, %v3045_v41 }
  0xc2   :  { %v697_v47 = vmax.f32 %v633_v61, 0.0  ;;  %v354_v57 = vadd.f32 %v290_v44, %v162_v36  ;;  %v370_v28 = vadd.f32 %v306_v22, %v178_v51  ;;  %v143_v31 = vmul.f32 %v2358_v18, %v2153_v3 }
  0xc3   :  { %955 = vmatpush.bf16.msra.mxu1 %v747_v4  ;;  %v713_v10 = vmax.f32 %v649_v38, 0.0  ;;  %v255_v27 = vmul.f32 %v2391_v42, %v1919_v60  ;;  %v271_v30 = vmul.f32 %v2391_v42, %v3046_v8  ;;  %v447_v43 = vmul.f32 %v2393_v21, %v2230_v29 }
  0xc4   :  { %v546_v20 = vadd.f32 %v482_v45, %v354_v57  ;;  %v562_v5 = vadd.f32 %v498_v56, %v370_v28  ;;  %v463_v55 = vmul.f32 %v2393_v21, %v3037_v2  ;;  %v128_v9 = vmul.f32 %v2406_v58, %v2219_v17 }
  0xc5   :  { %v748_v18 = vpack.c.bf16 %v713_v10, %v697_v47  ;;  %v319_v26 = vadd.f32 %v255_v27, %v127_v49  ;;  %v335_v23 = vadd.f32 %v271_v30, %v143_v31  ;;  %v144_v12 = vmul.f32 %v2406_v58, %v2153_v3  ;;  %v721_v27 = vld [vmem:[%s2952_s3 + $0x8] sm:$0x3] }
  0xc6   :  { %v634_v24 = vadd.f32 %v2284_v15, %v546_v20  ;;  %v650_v42 = vadd.f32 %v2192_v63, %v562_v5  ;;  %v256_v33 = vmul.f32 %v2417_v7, %v1919_v60  ;;  %v272_v32 = vmul.f32 %v2417_v7, %v3046_v8 }
  0xc7   :  { %973 = vmatpush.bf16.msra.mxu2 %v748_v18  ;;  %v511_v21 = vadd.f32 %v447_v43, %v319_v26  ;;  %v527_v39 = vadd.f32 %v463_v55, %v335_v23  ;;  %v448_v1 = vmul.f32 %v2419_v25, %v2230_v29  ;;  %v464_v46 = vmul.f32 %v2419_v25, %v3037_v2 }
  0xc8   :  { %v698_v58 = vmax.f32 %v634_v24, 0.0  ;;  %v714_v53 = vmax.f32 %v650_v42, 0.0  ;;  %v320_v36 = vadd.f32 %v256_v33, %v128_v9  ;;  %v336_v51 = vadd.f32 %v272_v32, %v144_v12 }
  0xc9   :  { %v599_v0 = vadd.f32 %v2265_v59, %v511_v21  ;;  %v615_v13 = vadd.f32 %v2313_v50, %v527_v39  ;;  %v129_v7 = vmul.f32 %v2431_v37, %v2219_v17  ;;  %v145_v35 = vmul.f32 %v2431_v37, %v2153_v3 }
  0xca   :  { %v749_v61 = vpack.c.bf16 %v714_v53, %v698_v58  ;;  %v512_v44 = vadd.f32 %v448_v1, %v320_v36  ;;  %v528_v22 = vadd.f32 %v464_v46, %v336_v51  ;;  %v257_v25 = vmul.f32 %v2433_v11, %v1919_v60 }
  0xcb   :  { %v663_v49 = vmax.f32 %v599_v0, 0.0  ;;  %v679_v4 = vmax.f32 %v615_v13, 0.0  ;;  %v273_v38 = vmul.f32 %v2433_v11, %v3046_v8  ;;  %v449_v45 = vmul.f32 %v2435_v40, %v2230_v29 }
  0xcc   :  { %991 = vmatpush.bf16.msra.mxu3 %v749_v61  ;;  %v600_v56 = vadd.f32 %v2265_v59, %v512_v44  ;;  %v616_v47 = vadd.f32 %v2313_v50, %v528_v22  ;;  %v321_v37 = vadd.f32 %v257_v25, %v129_v7  ;;  %v465_v57 = vmul.f32 %v2435_v40, %v3037_v2  ;;  %v37_v40 = vld [vmem:[%s2949_s0 + $0x30] sm:$0x77] }
  0xcd   :  { %v730_v28 = vpack.c.bf16 %v679_v4, %v663_v49  ;;  %v337_v31 = vadd.f32 %v273_v38, %v145_v35  ;;  %v130_v10 = vmul.f32 %v2449_v54, %v2219_v17  ;;  %v146_v11 = vmul.f32 %v2449_v54, %v2153_v3 }
  0xce   :  { %v664_v30 = vmax.f32 %v600_v56, 0.0  ;;  %v680_v43 = vmax.f32 %v616_v47, 0.0  ;;  %v513_v20 = vadd.f32 %v449_v45, %v321_v37  ;;  %v258_v5 = vmul.f32 %v2457_v48, %v1919_v60 }
  0xcf   :  { %938 = vmatpush.bf16.msra.mxu0 %v730_v28  ;;  %v529_v55 = vadd.f32 %v465_v57, %v337_v31  ;;  %v274_v9 = vmul.f32 %v2457_v48, %v3046_v8  ;;  %v450_v54 = vmul.f32 %v2459_v6, %v2230_v29  ;;  %v466_v18 = vmul.f32 %v2459_v6, %v3037_v2 }
  0xd0   :  { %v731_v26 = vpack.c.bf16 %v680_v43, %v664_v30  ;;  %v601_v23 = vadd.f32 %v2265_v59, %v513_v20  ;;  %v322_v12 = vadd.f32 %v258_v5, %v130_v10  ;;  %v777_v24 = vunpack.c.l.b16 %v721_v27 }
  0xd1   :  { %v617_v42 = vadd.f32 %v2313_v50, %v529_v55  ;;  %v338_v33 = vadd.f32 %v274_v9, %v146_v11  ;;  %v83_v32 = vperm.slane %v37_v40, 0  ;;  %v211_v21 = vperm.slane %v37_v40, 1  ;;  %v38_v11 = vld [vmem:[%s2949_s0 + $0x38] sm:$0x77] }
  0xd2   :  { %956 = vmatpush.bf16.msra.mxu1 %v731_v26  ;;  %v665_v39 = vmax.f32 %v601_v23, 0.0  ;;  %v514_v1 = vadd.f32 %v450_v54, %v322_v12  ;;  %v2533_v48 = vpack.c.b16 %v777_v24, %v777_v24  ;;  %v403_v46 = vperm.slane %v37_v40, 2 }
  0xd3   :  { %v681_v58 = vmax.f32 %v617_v42, 0.0  ;;  %v530_v53 = vadd.f32 %v466_v18, %v338_v33  ;;  %v2535_v36 = vperm.slane %v83_v32, 0  ;;  %v2537_v6 = vperm.slane %v211_v21, 1 }
  0xd4   :  { %v602_v51 = vadd.f32 %v2265_v59, %v514_v1  ;;  %1671 = vmatmul.msk.bf16.gmra.mxu0 %vm780_vm0, %v2533_v48  ;;  %1673 = vmatmul.msk.bf16.gmra.mxu1 %vm780_vm0, %v2533_v48  ;;  %v2544_v0 = vperm.slane %v403_v46, 2  ;;  %v84_v13 = vperm.slane %v37_v40, 4  ;;  %v212_v7 = vperm.slane %v37_v40, 5 }
  0xd5   :  { %v732_v35 = vpack.c.bf16 %v681_v58, %v665_v39  ;;  %v618_v61 = vadd.f32 %v2313_v50, %v530_v53  ;;  %1675 = vmatmul.msk.bf16.gmra.mxu2 %vm780_vm0, %v2533_v48  ;;  %1677 = vmatmul.msk.bf16.gmra.mxu3 %vm780_vm0, %v2533_v48  ;;  %v163_v44 = vmul.f32 %v2535_v36, %v3040_v19  ;;  %v404_v22 = vperm.slane %v37_v40, 6 }
  0xd6   :  { %v666_v25 = vmax.f32 %v602_v51, 0.0  ;;  %v179_v49 = vmul.f32 %v2535_v36, %v3041_v16  ;;  %v291_v4 = vmul.f32 %v2537_v6, %v3042_v52  ;;  %v307_v38 = vmul.f32 %v2537_v6, %v3043_v34 }
  0xd7   :  { %974 = vmatpush.bf16.msra.mxu2 %v732_v35  ;;  %v682_v45 = vmax.f32 %v618_v61, 0.0  ;;  %v483_v56 = vmul.f32 %v2544_v0, %v3044_v14  ;;  %v499_v47 = vmul.f32 %v2544_v0, %v3045_v41  ;;  %v2563_v37 = vperm.slane %v84_v13, 0 }
  0xd8   :  { %v355_v57 = vadd.f32 %v291_v4, %v163_v44  ;;  %v371_v28 = vadd.f32 %v307_v38, %v179_v49  ;;  %v2565_v31 = vperm.slane %v212_v7, 1  ;;  %v2567_v10 = vperm.slane %v404_v22, 2 }
  0xd9   :  { %v733_v27 = vpack.c.bf16 %v682_v45, %v666_v25  ;;  %v164_v30 = vmul.f32 %v2563_v37, %v3040_v19  ;;  %v180_v43 = vmul.f32 %v2563_v37, %v3041_v16  ;;  %v85_v20 = vperm.slane %v38_v11, 0 }
  0xda   :  { %v547_v5 = vadd.f32 %v483_v56, %v355_v57  ;;  %v563_v40 = vadd.f32 %v499_v47, %v371_v28  ;;  %v292_v55 = vmul.f32 %v2565_v31, %v3042_v52  ;;  %v308_v9 = vmul.f32 %v2565_v31, %v3043_v34 }
  0xdb   :  { %992 = vmatpush.bf16.msra.mxu3 %v733_v27  ;;  %v484_v54 = vmul.f32 %v2567_v10, %v3044_v14  ;;  %v500_v18 = vmul.f32 %v2567_v10, %v3045_v41  ;;  %v2584_v26 = vperm.slane %v85_v20, 0  ;;  %v213_v23 = vperm.slane %v38_v11, 1 }
  0xdc   :  { %v635_v12 = vadd.f32 %v2284_v15, %v547_v5  ;;  %v651_v24 = vadd.f32 %v2192_v63, %v563_v40  ;;  %v356_v42 = vadd.f32 %v292_v55, %v164_v30  ;;  %v372_v33 = vadd.f32 %v308_v9, %v180_v43 }
  0xdd   :  { %v165_v32 = vmul.f32 %v2584_v26, %v3040_v19  ;;  %v181_v21 = vmul.f32 %v2584_v26, %v3041_v16  ;;  %v2592_v39 = vperm.slane %v213_v23, 1  ;;  %v405_v1 = vperm.slane %v38_v11, 2 }
  0xde   :  { %v699_v46 = vmax.f32 %v635_v12, 0.0  ;;  %v715_v58 = vmax.f32 %v651_v24, 0.0  ;;  %v548_v53 = vadd.f32 %v484_v54, %v356_v42  ;;  %v564_v51 = vadd.f32 %v500_v18, %v372_v33 }
  0xdf   :  { %v293_v13 = vmul.f32 %v2592_v39, %v3042_v52  ;;  %v309_v7 = vmul.f32 %v2592_v39, %v3043_v34  ;;  %v2598_v35 = vperm.slane %v405_v1, 2  ;;  %v86_v61 = vperm.slane %v38_v11, 4 }
  0xe0   :  { %v750_v44 = vpack.c.bf16 %v715_v58, %v699_v46  ;;  %v636_v22 = vadd.f32 %v2284_v15, %v548_v53  ;;  %v652_v25 = vadd.f32 %v2192_v63, %v564_v51  ;;  %v214_v49 = vperm.slane %v38_v11, 5 }
  0xe1   :  { %v357_v4 = vadd.f32 %v293_v13, %v165_v32  ;;  %v373_v38 = vadd.f32 %v309_v7, %v181_v21  ;;  %v485_v45 = vmul.f32 %v2598_v35, %v3044_v14  ;;  %v501_v56 = vmul.f32 %v2598_v35, %v3045_v41 }
  0xe2   :  { %v700_v47 = vmax.f32 %v636_v22, 0.0  ;;  %v716_v57 = vmax.f32 %v652_v25, 0.0  ;;  %v2606_v28 = vperm.slane %v86_v61, 0  ;;  %v2608_v27 = vperm.slane %v214_v49, 1 }
  0xe3   :  { %v549_v30 = vadd.f32 %v485_v45, %v357_v4  ;;  %v565_v43 = vadd.f32 %v501_v56, %v373_v38  ;;  %v406_v20 = vperm.slane %v38_v11, 6  ;;  %v131_v5 = vmul.f32 %v2535_v36, %v2219_v17 }
  0xe4   :  { %1678 = vmatmul.msk.bf16.vlgmr.msrb.gmra.mxu0 %vm780_vm0, %v2343_v62  ;;  %1680 = vmatmul.msk.bf16.vlgmr.msrb.gmra.mxu1 %vm780_vm0, %v2343_v62  ;;  %v751_v40 = vpack.c.bf16 %v716_v57, %v700_v47  ;;  %v166_v55 = vmul.f32 %v2606_v28, %v3040_v19  ;;  %v182_v9 = vmul.f32 %v2606_v28, %v3041_v16 }
  0xe5   :  { %1682 = vmatmul.msk.bf16.vlgmr.msrb.gmra.mxu2 %vm780_vm0, %v2343_v62  ;;  %1684 = vmatmul.msk.bf16.vlgmr.msrb.gmra.mxu3 %vm780_vm0, %v2343_v62  ;;  %v637_v11 = vadd.f32 %v2284_v15, %v549_v30  ;;  %v653_v54 = vadd.f32 %v2192_v63, %v565_v43  ;;  %v294_v18 = vmul.f32 %v2608_v27, %v3042_v52  ;;  %v2628_v23 = vperm.slane %v406_v20, 2 }
  0xe6   :  { %1009 = vmatpush.bf16.msrb.mxu0 %v750_v44  ;;  %1027 = vmatpush.bf16.msrb.mxu1 %v751_v40  ;;  %v310_v19 = vmul.f32 %v2608_v27, %v3043_v34  ;;  %v147_v16 = vmul.f32 %v2535_v36, %v2153_v3  ;;  %v259_v12 = vmul.f32 %v2537_v6, %v1919_v60 }
  0xe7   :  { %v701_v24 = vmax.f32 %v637_v11, 0.0  ;;  %v717_v42 = vmax.f32 %v653_v54, 0.0  ;;  %v358_v33 = vadd.f32 %v294_v18, %v166_v55  ;;  %v486_v32 = vmul.f32 %v2628_v23, %v3044_v14 }
  0xe8   :  { %v374_v52 = vadd.f32 %v310_v19, %v182_v9  ;;  %v502_v21 = vmul.f32 %v2628_v23, %v3045_v41  ;;  %v275_v1 = vmul.f32 %v2537_v6, %v3046_v8  ;;  %v323_v34 = vadd.f32 %v259_v12, %v131_v5 }
  0xe9   :  { %v752_v46 = vpack.c.bf16 %v717_v42, %v701_v24  ;;  %v550_v58 = vadd.f32 %v486_v32, %v358_v33  ;;  %v451_v36 = vmul.f32 %v2544_v0, %v2230_v29  ;;  %v467_v53 = vmul.f32 %v2544_v0, %v3037_v2 }
  0xea   :  { %v566_v51 = vadd.f32 %v502_v21, %v374_v52  ;;  %v339_v13 = vadd.f32 %v275_v1, %v147_v16  ;;  %v132_v14 = vmul.f32 %v2563_v37, %v2219_v17  ;;  %v148_v41 = vmul.f32 %v2563_v37, %v2153_v3 }
  0xeb   :  { %1045 = vmatpush.bf16.msrb.mxu2 %v752_v46  ;;  %v638_v6 = vadd.f32 %v2284_v15, %v550_v58  ;;  %v515_v7 = vadd.f32 %v451_v36, %v323_v34  ;;  %v260_v61 = vmul.f32 %v2565_v31, %v1919_v60  ;;  %v276_v44 = vmul.f32 %v2565_v31, %v3046_v8 }
  0xec   :  { %v654_v0 = vadd.f32 %v2192_v63, %v566_v51  ;;  %v531_v22 = vadd.f32 %v467_v53, %v339_v13  ;;  %v452_v25 = vmul.f32 %v2567_v10, %v2230_v29  ;;  %v468_v49 = vmul.f32 %v2567_v10, %v3037_v2 }
  0xed   :  { %v702_v37 = vmax.f32 %v638_v6, 0.0  ;;  %v603_v4 = vadd.f32 %v2265_v59, %v515_v7  ;;  %v324_v15 = vadd.f32 %v260_v61, %v132_v14  ;;  %v340_v38 = vadd.f32 %v276_v44, %v148_v41  ;;  %v2732_v41 = vpop.permute.xlu2 %769 }
  0xee   :  { %v718_v45 = vmax.f32 %v654_v0, 0.0  ;;  %v619_v56 = vadd.f32 %v2313_v50, %v531_v22  ;;  %v133_v31 = vmul.f32 %v2584_v26, %v2219_v17  ;;  %v149_v63 = vmul.f32 %v2584_v26, %v2153_v3 }
  0xef   :  { %v667_v47 = vmax.f32 %v603_v4, 0.0  ;;  %v516_v57 = vadd.f32 %v452_v25, %v324_v15  ;;  %v532_v30 = vadd.f32 %v468_v49, %v340_v38  ;;  %v261_v10 = vmul.f32 %v2592_v39, %v1919_v60  ;;  %v2740_v49 = vpop.permute.xlu1 %759 }
  0xf0   :  { %v753_v43 = vpack.c.bf16 %v718_v45, %v702_v37  ;;  %v683_v20 = vmax.f32 %v619_v56, 0.0  ;;  %v277_v5 = vmul.f32 %v2592_v39, %v3046_v8  ;;  %v453_v40 = vmul.f32 %v2598_v35, %v2230_v29 }
  0xf1   :  { %v604_v55 = vadd.f32 %v2265_v59, %v516_v57  ;;  %v620_v9 = vadd.f32 %v2313_v50, %v532_v30  ;;  %v325_v11 = vadd.f32 %v261_v10, %v133_v31  ;;  %v469_v26 = vmul.f32 %v2598_v35, %v3037_v2 }
  0xf2   :  { %1063 = vmatpush.bf16.msrb.mxu3 %v753_v43  ;;  %v734_v54 = vpack.c.bf16 %v683_v20, %v667_v47  ;;  %v341_v18 = vadd.f32 %v277_v5, %v149_v63  ;;  %v134_v19 = vmul.f32 %v2606_v28, %v2219_v17  ;;  %v150_v39 = vmul.f32 %v2606_v28, %v2153_v3 }
  0xf3   :  { %v668_v16 = vmax.f32 %v604_v55, 0.0  ;;  %v684_v12 = vmax.f32 %v620_v9, 0.0  ;;  %v517_v24 = vadd.f32 %v453_v40, %v325_v11  ;;  %v262_v42 = vmul.f32 %v2608_v27, %v1919_v60 }
  0xf4   :  { %1010 = vmatpush.bf16.msrb.mxu0 %v734_v54  ;;  %v533_v33 = vadd.f32 %v469_v26, %v341_v18  ;;  %v278_v35 = vmul.f32 %v2608_v27, %v3046_v8  ;;  %v454_v32 = vmul.f32 %v2628_v23, %v2230_v29  ;;  %v470_v17 = vmul.f32 %v2628_v23, %v3037_v2 }
  0xf5   :  { %v735_v52 = vpack.c.bf16 %v684_v12, %v668_v16  ;;  %v605_v3 = vadd.f32 %v2265_v59, %v517_v24  ;;  %v326_v28 = vadd.f32 %v262_v42, %v134_v19  ;;  %1679 = vmatmul.msk.bf16.gmra.mxu0 %vm780_vm0, %v2533_v48  ;;  %1681 = vmatmul.msk.bf16.gmra.mxu1 %vm780_vm0, %v2533_v48  ;;  %v2734_v44 = vpop.permute.xlu2 %764 }
  0xf6   :  { %v621_v60 = vadd.f32 %v2313_v50, %v533_v33  ;;  %v342_v21 = vadd.f32 %v278_v35, %v150_v39  ;;  %1683 = vmatmul.msk.bf16.gmra.mxu2 %vm780_vm0, %v2533_v48  ;;  %1685 = vmatmul.msk.bf16.gmra.mxu3 %vm780_vm0, %v2533_v48  ;;  %v2755_v33 = vld [vmem:[%s2954_s5] sm:$0xff] }
  0xf7   :  { %1028 = vmatpush.bf16.msrb.mxu1 %v735_v52  ;;  %v518_v29 = vadd.f32 %v454_v32, %v326_v28  ;;  %v669_v2 = vmax.f32 %v605_v3, 0.0 }
  0xf8   :  { %v685_v8 = vmax.f32 %v621_v60, 0.0  ;;  %v534_v27 = vadd.f32 %v470_v17, %v342_v21 }
  0xf9   :  { %v606_v23 = vadd.f32 %v2265_v59, %v518_v29 }
  0xfa   :  { %v736_v1 = vpack.c.bf16 %v685_v8, %v669_v2  ;;  %v622_v34 = vadd.f32 %v2313_v50, %v534_v27 }
  0xfb   :  { %v670_v46 = vmax.f32 %v606_v23, 0.0  ;;  %v1125_v23 = vld [vmem:[%s2954_s5 + $0x8] sm:$0x3] }
  0xfc   :  { %1046 = vmatpush.bf16.msrb.mxu2 %v736_v1  ;;  %v686_v58 = vmax.f32 %v622_v34, 0.0 }
  0xfe   :  { %v737_v36 = vpack.c.bf16 %v686_v58, %v670_v46 }
 0x100   :  { %1064 = vmatpush.bf16.msrb.mxu3 %v737_v36  ;;  %v1181_v36 = vunpack.c.l.b16 %v1125_v23 }
 0x105   :  { %1686 = vmatmul.msk.bf16.vlgmr.msra.gmra.mxu0 %vm780_vm0, %v2343_v62  ;;  %1688 = vmatmul.msk.bf16.vlgmr.msra.gmra.mxu1 %vm780_vm0, %v2343_v62 }
 0x106   :  { %1690 = vmatmul.msk.bf16.vlgmr.msra.gmra.mxu2 %vm780_vm0, %v2343_v62  ;;  %1692 = vmatmul.msk.bf16.vlgmr.msra.gmra.mxu3 %vm780_vm0, %v2343_v62 }
 0x115   :  { %1687 = vmatmul.msk.bf16.gmra.mxu0 %vm780_vm0, %v2533_v48  ;;  %1689 = vmatmul.msk.bf16.gmra.mxu1 %vm780_vm0, %v2533_v48 }
 0x116   :  { %1691 = vmatmul.msk.bf16.gmra.mxu2 %vm780_vm0, %v2533_v48  ;;  %1693 = vmatmul.msk.bf16.gmra.mxu3 %vm780_vm0, %v2533_v48 }
 0x125   :  { %1694 = vmatmul.msk.bf16.vlgmr.msrb.gmra.mxu0 %vm780_vm0, %v2343_v62  ;;  %1696 = vmatmul.msk.bf16.vlgmr.msrb.gmra.mxu1 %vm780_vm0, %v2343_v62 }
 0x126   :  { %1698 = vmatmul.msk.bf16.vlgmr.msrb.gmra.mxu2 %vm780_vm0, %v2343_v62  ;;  %1700 = vmatmul.msk.bf16.vlgmr.msrb.gmra.mxu3 %vm780_vm0, %v2343_v62  ;;  %v796_v59 = vpop.f32.mrf.mxu0  ;;  %v814_v50 = vpop.f32.mrf.mxu1 }
 0x127   :  { %v797_v15 = vadd.f32 %v796_v59, %v2740_v49  ;;  %v815_v38 = vadd.f32 %v814_v50, %v2740_v49  ;;  %v2770_v59 = vpack.c.b16 %v1181_v36, %v1181_v36 }
 0x129   :  { %v1075_v43 = vmax.f32 %v797_v15, 0.0  ;;  %v1076_v20 = vmax.f32 %v815_v38, 0.0 }
 0x12e   :  { %v798_v13 = vpop.f32.mrf.mxu0  ;;  %v816_v14 = vpop.f32.mrf.mxu1 }
 0x12f   :  { %v832_v53 = vpop.f32.mrf.mxu2  ;;  %v850_v51 = vpop.f32.mrf.mxu3  ;;  %v817_v25 = vadd.f32 %v816_v14, %v2734_v44 }
 0x130   :  { %v833_v16 = vadd.f32 %v832_v53, %v2740_v49  ;;  %v851_v12 = vadd.f32 %v850_v51, %v2740_v49 }
 0x131   :  { %v1092_v63 = vmax.f32 %v817_v25, 0.0 }
 0x132   :  { %v1077_v3 = vmax.f32 %v833_v16, 0.0  ;;  %v1078_v28 = vmax.f32 %v851_v12, 0.0 }
 0x133   :  { %v1127_v39 = vpack.c.bf16 %v1092_v63, %v1076_v20 }
 0x135   :  { %1695 = vmatmul.msk.bf16.gmra.mxu0 %vm780_vm0, %v2533_v48  ;;  %1697 = vmatmul.msk.bf16.gmra.mxu1 %vm780_vm0, %v2533_v48 }
 0x136   :  { %1699 = vmatmul.msk.bf16.gmra.mxu2 %vm780_vm0, %v2533_v48  ;;  %1701 = vmatmul.msk.bf16.gmra.mxu3 %vm780_vm0, %v2533_v48  ;;  %v799_v48 = vadd.f32 %v798_v13, %v2734_v44 }
 0x137   :  { %v834_v62 = vpop.f32.mrf.mxu2  ;;  %v852_v6 = vpop.f32.mrf.mxu3 }
 0x138   :  { %v1091_v31 = vmax.f32 %v799_v48, 0.0  ;;  %v835_v11 = vadd.f32 %v834_v62, %v2734_v44  ;;  %v853_v26 = vadd.f32 %v852_v6, %v2734_v44 }
 0x13a   :  { %v1126_v19 = vpack.c.bf16 %v1091_v31, %v1075_v43  ;;  %v1093_v35 = vmax.f32 %v835_v11, 0.0  ;;  %v1094_v32 = vmax.f32 %v853_v26, 0.0 }
 0x13c   :  { %v1128_v8 = vpack.c.bf16 %v1093_v35, %v1077_v3  ;;  %v1129_v27 = vpack.c.bf16 %v1094_v32, %v1078_v28 }
 0x151   :  { %v801_v7 = vpop.f32.mrf.mxu0  ;;  %v819_v61 = vpop.f32.mrf.mxu1 }
 0x152   :  { %v802_v0 = vadd.f32 %v801_v7, %v2732_v41  ;;  %v820_v22 = vadd.f32 %v819_v61, %v2732_v41 }
 0x154   :  { %v1107_v37 = vmax.f32 %v802_v0, 0.0  ;;  %v1108_v4 = vmax.f32 %v820_v22, 0.0 }
 0x156   :  { %v1142_v45 = vpack.c.bf16 %v1107_v37, %v1107_v37  ;;  %v1143_v56 = vpack.c.bf16 %v1108_v4, %v1108_v4 }
 0x158   :  { %v837_v47 = vpop.f32.mrf.mxu2  ;;  %v855_v57 = vpop.f32.mrf.mxu3  ;;  %v1193_v30 = vsel %vm1191_vm1, %v1142_v45, 0  ;;  %v1196_v10 = vsel %vm1191_vm1, %v1143_v56, 0 }
 0x159   :  { %v838_v5 = vadd.f32 %v837_v47, %v2732_v41  ;;  %v856_v40 = vadd.f32 %v855_v57, %v2732_v41  ;;  %v803_v55 = vpop.f32.mrf.mxu0  ;;  %v821_v9 = vpop.f32.mrf.mxu1  ;;  %1246 = vmatpush.bf16.msra.mxu0 %v1193_v30  ;;  %1264 = vmatpush.bf16.msra.mxu1 %v1196_v10 }
 0x15b   :  { %v1109_v54 = vmax.f32 %v838_v5, 0.0  ;;  %v1110_v18 = vmax.f32 %v856_v40, 0.0 }
 0x15d   :  { %v1144_v24 = vpack.c.bf16 %v1109_v54, %v1109_v54  ;;  %v1145_v42 = vpack.c.bf16 %v1110_v18, %v1110_v18  ;;  %1247 = vmatpush.bf16.msra.mxu0 %v1126_v19  ;;  %1265 = vmatpush.bf16.msra.mxu1 %v1127_v39 }
 0x15f   :  { %v1199_v17 = vsel %vm1191_vm1, %v1144_v24, 0  ;;  %v1202_v52 = vsel %vm1191_vm1, %v1145_v42, 0 }
 0x160   :  { %v839_v60 = vpop.f32.mrf.mxu2  ;;  %v857_v21 = vpop.f32.mrf.mxu3  ;;  %1282 = vmatpush.bf16.msra.mxu2 %v1199_v17  ;;  %1300 = vmatpush.bf16.msra.mxu3 %v1202_v52 }
 0x161   :  { %1706 = vmatmul.msk.bf16.vlgmr.msra.gmra.mxu0 %vm1184_vm2, %v2755_v33  ;;  %1708 = vmatmul.msk.bf16.vlgmr.msra.gmra.mxu1 %vm1184_vm2, %v2755_v33  ;;  %v868_v29 = vpop.f32.mrf.mxu0  ;;  %v886_v2 = vpop.f32.mrf.mxu1 }
 0x162   :  { %v869_v22 = vadd.f32 %v868_v29, %v2740_v49  ;;  %v887_v48 = vadd.f32 %v886_v2, %v2740_v49 }
 0x164   :  { %1283 = vmatpush.bf16.msra.mxu2 %v1128_v8  ;;  %1301 = vmatpush.bf16.msra.mxu3 %v1129_v27  ;;  %v1079_v63 = vmax.f32 %v869_v22, 0.0  ;;  %v1080_v47 = vmax.f32 %v887_v48, 0.0 }
 0x167   :  { %1710 = vmatmul.msk.bf16.vlgmr.msra.gmra.mxu2 %vm1184_vm2, %v2755_v33  ;;  %1712 = vmatmul.msk.bf16.vlgmr.msra.gmra.mxu3 %vm1184_vm2, %v2755_v33 }
 0x168   :  { %v904_v1 = vpop.f32.mrf.mxu2  ;;  %v922_v34 = vpop.f32.mrf.mxu3 }
 0x169   :  { %v870_v46 = vpop.f32.mrf.mxu0  ;;  %v888_v58 = vpop.f32.mrf.mxu1  ;;  %v905_v26 = vadd.f32 %v904_v1, %v2740_v49  ;;  %v923_v54 = vadd.f32 %v922_v34, %v2740_v49 }
 0x16a   :  { %v871_v6 = vadd.f32 %v870_v46, %v2734_v44  ;;  %v889_v7 = vadd.f32 %v888_v58, %v2734_v44 }
 0x16b   :  { %v1081_v42 = vmax.f32 %v905_v26, 0.0  ;;  %v1082_v35 = vmax.f32 %v923_v54, 0.0 }
 0x16c   :  { %v1095_v4 = vmax.f32 %v871_v6, 0.0  ;;  %v1096_v15 = vmax.f32 %v889_v7, 0.0 }
 0x16e   :  { %v1130_v9 = vpack.c.bf16 %v1095_v4, %v1079_v63  ;;  %v1131_v11 = vpack.c.bf16 %v1096_v15, %v1080_v47 }
 0x170   :  { %v906_v50 = vpop.f32.mrf.mxu2  ;;  %v924_v53 = vpop.f32.mrf.mxu3 }
 0x171   :  { %1707 = vmatmul.msk.bf16.gmra.mxu0 %vm1184_vm2, %v2770_v59  ;;  %1709 = vmatmul.msk.bf16.gmra.mxu1 %vm1184_vm2, %v2770_v59  ;;  %v907_v20 = vadd.f32 %v906_v50, %v2734_v44  ;;  %v925_v5 = vadd.f32 %v924_v53, %v2734_v44 }
 0x172   :  { %v873_v51 = vpop.f32.mrf.mxu0  ;;  %v891_v13 = vpop.f32.mrf.mxu1 }
 0x173   :  { %v874_v14 = vadd.f32 %v873_v51, %v2732_v41  ;;  %v892_v62 = vadd.f32 %v891_v13, %v2732_v41  ;;  %v1097_v39 = vmax.f32 %v907_v20, 0.0  ;;  %v1098_v16 = vmax.f32 %v925_v5, 0.0 }
 0x175   :  { %v1111_v61 = vmax.f32 %v874_v14, 0.0  ;;  %v1112_v0 = vmax.f32 %v892_v62, 0.0  ;;  %v1132_v28 = vpack.c.bf16 %v1097_v39, %v1081_v42  ;;  %v1133_v60 = vpack.c.bf16 %v1098_v16, %v1082_v35 }
 0x177   :  { %v1146_v25 = vpack.c.bf16 %v1111_v61, %v1111_v61  ;;  %v1147_v37 = vpack.c.bf16 %v1112_v0, %v1112_v0  ;;  %1711 = vmatmul.msk.bf16.gmra.mxu2 %vm1184_vm2, %v2770_v59  ;;  %1713 = vmatmul.msk.bf16.gmra.mxu3 %vm1184_vm2, %v2770_v59 }
 0x179   :  { %v909_v38 = vpop.f32.mrf.mxu2  ;;  %v927_v45 = vpop.f32.mrf.mxu3  ;;  %v1205_v56 = vsel %vm1191_vm1, %v1146_v25, 0  ;;  %v1208_v31 = vsel %vm1191_vm1, %v1147_v37, 0 }
 0x17a   :  { %v910_v57 = vadd.f32 %v909_v38, %v2732_v41  ;;  %v928_v30 = vadd.f32 %v927_v45, %v2732_v41  ;;  %v875_v10 = vpop.f32.mrf.mxu0  ;;  %v893_v43 = vpop.f32.mrf.mxu1  ;;  %1318 = vmatpush.bf16.msrb.mxu0 %v1205_v56  ;;  %1336 = vmatpush.bf16.msrb.mxu1 %v1208_v31 }
 0x17c   :  { %v1113_v40 = vmax.f32 %v910_v57, 0.0  ;;  %v1114_v55 = vmax.f32 %v928_v30, 0.0 }
 0x17e   :  { %v1148_v18 = vpack.c.bf16 %v1113_v40, %v1113_v40  ;;  %v1149_v19 = vpack.c.bf16 %v1114_v55, %v1114_v55  ;;  %1319 = vmatpush.bf16.msrb.mxu0 %v1130_v9  ;;  %1337 = vmatpush.bf16.msrb.mxu1 %v1131_v11 }
 0x180   :  { %v1211_v12 = vsel %vm1191_vm1, %v1148_v18, 0  ;;  %v1214_v24 = vsel %vm1191_vm1, %v1149_v19, 0 }
 0x181   :  { %v911_v32 = vpop.f32.mrf.mxu2  ;;  %v929_v17 = vpop.f32.mrf.mxu3  ;;  %1354 = vmatpush.bf16.msrb.mxu2 %v1211_v12  ;;  %1372 = vmatpush.bf16.msrb.mxu3 %v1214_v24 }
 0x182   :  { %1714 = vmatmul.msk.bf16.vlgmr.msrb.gmra.mxu0 %vm1184_vm2, %v2755_v33  ;;  %1716 = vmatmul.msk.bf16.vlgmr.msrb.gmra.mxu1 %vm1184_vm2, %v2755_v33  ;;  %v940_v52 = vpop.f32.mrf.mxu0  ;;  %v958_v3 = vpop.f32.mrf.mxu1 }
 0x183   :  { %v941_v13 = vadd.f32 %v940_v52, %v2740_v49  ;;  %v959_v14 = vadd.f32 %v958_v3, %v2740_v49 }
 0x185   :  { %1355 = vmatpush.bf16.msrb.mxu2 %v1132_v28  ;;  %1373 = vmatpush.bf16.msrb.mxu3 %v1133_v60  ;;  %v1083_v37 = vmax.f32 %v941_v13, 0.0  ;;  %v1084_v4 = vmax.f32 %v959_v14, 0.0 }
 0x188   :  { %1718 = vmatmul.msk.bf16.vlgmr.msrb.gmra.mxu2 %vm1184_vm2, %v2755_v33  ;;  %1720 = vmatmul.msk.bf16.vlgmr.msrb.gmra.mxu3 %vm1184_vm2, %v2755_v33 }
 0x189   :  { %v976_v21 = vpop.f32.mrf.mxu2  ;;  %v994_v29 = vpop.f32.mrf.mxu3 }
 0x18a   :  { %v942_v2 = vpop.f32.mrf.mxu0  ;;  %v960_v8 = vpop.f32.mrf.mxu1  ;;  %v977_v43 = vadd.f32 %v976_v21, %v2740_v49  ;;  %v995_v20 = vadd.f32 %v994_v29, %v2740_v49 }
 0x18b   :  { %v943_v36 = vadd.f32 %v942_v2, %v2734_v44  ;;  %v961_v50 = vadd.f32 %v960_v8, %v2734_v44 }
 0x18c   :  { %v1085_v54 = vmax.f32 %v977_v43, 0.0  ;;  %v1086_v18 = vmax.f32 %v995_v20, 0.0 }
 0x18d   :  { %v1099_v7 = vmax.f32 %v943_v36, 0.0  ;;  %v1100_v61 = vmax.f32 %v961_v50, 0.0 }
 0x18f   :  { %v1134_v47 = vpack.c.bf16 %v1099_v7, %v1083_v37  ;;  %v1135_v57 = vpack.c.bf16 %v1100_v61, %v1084_v4 }
 0x191   :  { %v978_v27 = vpop.f32.mrf.mxu2  ;;  %v996_v23 = vpop.f32.mrf.mxu3 }
 0x192   :  { %1715 = vmatmul.msk.bf16.gmra.mxu0 %vm1184_vm2, %v2770_v59  ;;  %1717 = vmatmul.msk.bf16.gmra.mxu1 %vm1184_vm2, %v2770_v59  ;;  %v945_v1 = vpop.f32.mrf.mxu0  ;;  %v963_v34 = vpop.f32.mrf.mxu1  ;;  %v979_v31 = vadd.f32 %v978_v27, %v2734_v44  ;;  %v997_v63 = vadd.f32 %v996_v23, %v2734_v44 }
 0x193   :  { %v946_v46 = vadd.f32 %v945_v1, %v2732_v41  ;;  %v964_v58 = vadd.f32 %v963_v34, %v2732_v41 }
 0x194   :  { %v1101_v55 = vmax.f32 %v979_v31, 0.0  ;;  %v1102_v9 = vmax.f32 %v997_v63, 0.0 }
 0x195   :  { %v1115_v53 = vmax.f32 %v946_v46, 0.0  ;;  %v1116_v51 = vmax.f32 %v964_v58, 0.0 }
 0x196   :  { %v1136_v24 = vpack.c.bf16 %v1101_v55, %v1085_v54  ;;  %v1137_v42 = vpack.c.bf16 %v1102_v9, %v1086_v18  ;;  %v2876_v55 = vpop.permute.xlu2 %1163 }
 0x197   :  { %v1150_v62 = vpack.c.bf16 %v1115_v53, %v1115_v53  ;;  %v1151_v6 = vpack.c.bf16 %v1116_v51, %v1116_v51 }
 0x198   :  { %1719 = vmatmul.msk.bf16.gmra.mxu2 %vm1184_vm2, %v2770_v59  ;;  %1721 = vmatmul.msk.bf16.gmra.mxu3 %vm1184_vm2, %v2770_v59 }
 0x199   :  { %v981_v0 = vpop.f32.mrf.mxu2  ;;  %v999_v22 = vpop.f32.mrf.mxu3  ;;  %v1217_v48 = vsel %vm1191_vm1, %v1150_v62, 0  ;;  %v1220_v25 = vsel %vm1191_vm1, %v1151_v6, 0 }
 0x19a   :  { %v982_v15 = vadd.f32 %v981_v0, %v2732_v41  ;;  %v1000_v38 = vadd.f32 %v999_v22, %v2732_v41  ;;  %v947_v45 = vpop.f32.mrf.mxu0  ;;  %v965_v56 = vpop.f32.mrf.mxu1  ;;  %1390 = vmatpush.bf16.msra.mxu0 %v1217_v48  ;;  %1408 = vmatpush.bf16.msra.mxu1 %v1220_v25 }
 0x19c   :  { %v1117_v30 = vmax.f32 %v982_v15, 0.0  ;;  %v1118_v10 = vmax.f32 %v1000_v38, 0.0 }
 0x19e   :  { %v1152_v5 = vpack.c.bf16 %v1117_v30, %v1117_v30  ;;  %v1153_v40 = vpack.c.bf16 %v1118_v10, %v1118_v10  ;;  %1391 = vmatpush.bf16.msra.mxu0 %v1134_v47  ;;  %1409 = vmatpush.bf16.msra.mxu1 %v1135_v57 }
 0x1a0   :  { %v1223_v11 = vsel %vm1191_vm1, %v1152_v5, 0  ;;  %v1226_v26 = vsel %vm1191_vm1, %v1153_v40, 0 }
 0x1a1   :  { %v983_v19 = vpop.f32.mrf.mxu2  ;;  %v1001_v39 = vpop.f32.mrf.mxu3  ;;  %1426 = vmatpush.bf16.msra.mxu2 %v1223_v11  ;;  %1444 = vmatpush.bf16.msra.mxu3 %v1226_v26 }
 0x1a2   :  { %1722 = vmatmul.msk.bf16.vlgmr.msra.gmra.mxu0 %vm1184_vm2, %v2755_v33  ;;  %1724 = vmatmul.msk.bf16.vlgmr.msra.gmra.mxu1 %vm1184_vm2, %v2755_v33  ;;  %v1012_v16 = vpop.f32.mrf.mxu0  ;;  %v1030_v12 = vpop.f32.mrf.mxu1 }
 0x1a3   :  { %v1013_v34 = vadd.f32 %v1012_v16, %v2740_v49  ;;  %v1031_v46 = vadd.f32 %v1030_v12, %v2740_v49  ;;  %v2880_v39 = vpop.permute.xlu1 %1168 }
 0x1a5   :  { %1427 = vmatpush.bf16.msra.mxu2 %v1136_v24  ;;  %1445 = vmatpush.bf16.msra.mxu3 %v1137_v42  ;;  %v1087_v6 = vmax.f32 %v1013_v34, 0.0  ;;  %v1088_v7 = vmax.f32 %v1031_v46, 0.0 }
 0x1a8   :  { %1726 = vmatmul.msk.bf16.vlgmr.msra.gmra.mxu2 %vm1184_vm2, %v2755_v33  ;;  %1728 = vmatmul.msk.bf16.vlgmr.msra.gmra.mxu3 %vm1184_vm2, %v2755_v33 }
 0x1a9   :  { %v1048_v35 = vpop.f32.mrf.mxu2  ;;  %v1066_v32 = vpop.f32.mrf.mxu3 }
 0x1aa   :  { %v1014_v17 = vpop.f32.mrf.mxu0  ;;  %v1032_v52 = vpop.f32.mrf.mxu1  ;;  %v1049_v56 = vadd.f32 %v1048_v35, %v2740_v49  ;;  %v1067_v31 = vadd.f32 %v1066_v32, %v2740_v49 }
 0x1ab   :  { %v1015_v8 = vadd.f32 %v1014_v17, %v2734_v44  ;;  %v1033_v27 = vadd.f32 %v1032_v52, %v2734_v44 }
 0x1ac   :  { %v1089_v43 = vmax.f32 %v1049_v56, 0.0 }
 0x1ad   :  { %v1103_v50 = vmax.f32 %v1015_v8, 0.0  ;;  %v1104_v53 = vmax.f32 %v1033_v27, 0.0 }
 0x1af   :  { %v1138_v4 = vpack.c.bf16 %v1103_v50, %v1087_v6  ;;  %v1139_v15 = vpack.c.bf16 %v1104_v53, %v1088_v7 }
 0x1b1   :  { %v1050_v3 = vpop.f32.mrf.mxu2  ;;  %v1068_v28 = vpop.f32.mrf.mxu3 }
 0x1b2   :  { %1723 = vmatmul.msk.bf16.gmra.mxu0 %vm1184_vm2, %v2770_v59  ;;  %1725 = vmatmul.msk.bf16.gmra.mxu1 %vm1184_vm2, %v2770_v59  ;;  %v1017_v60 = vpop.f32.mrf.mxu0  ;;  %v1035_v21 = vpop.f32.mrf.mxu1  ;;  %v1051_v25 = vadd.f32 %v1050_v3, %v2734_v44  ;;  %v1069_v37 = vadd.f32 %v1068_v28, %v2734_v44  ;;  %v1090_v44 = vmax.f32 %v1067_v31, 0.0 }
 0x1b3   :  { %v1018_v29 = vadd.f32 %v1017_v60, %v2732_v41  ;;  %v1036_v2 = vadd.f32 %v1035_v21, %v2732_v41  ;;  %v2886_v60 = vpop.permute.xlu0 %1173 }
 0x1b4   :  { %v1106_v57 = vmax.f32 %v1069_v37, 0.0 }
 0x1b5   :  { %v1119_v23 = vmax.f32 %v1018_v29, 0.0  ;;  %v1120_v1 = vmax.f32 %v1036_v2, 0.0 }
 0x1b6   :  { %v1141_v40 = vpack.c.bf16 %v1106_v57, %v1090_v44 }
 0x1b7   :  { %v1154_v58 = vpack.c.bf16 %v1119_v23, %v1119_v23  ;;  %v1155_v36 = vpack.c.bf16 %v1120_v1, %v1120_v1 }
 0x1b8   :  { %1727 = vmatmul.msk.bf16.gmra.mxu2 %vm1184_vm2, %v2770_v59  ;;  %1729 = vmatmul.msk.bf16.gmra.mxu3 %vm1184_vm2, %v2770_v59 }
 0x1b9   :  { %v1053_v51 = vpop.f32.mrf.mxu2  ;;  %v1071_v13 = vpop.f32.mrf.mxu3  ;;  %v1229_v14 = vsel %vm1191_vm1, %v1154_v58, 0  ;;  %v1232_v62 = vsel %vm1191_vm1, %v1155_v36, 0 }
 0x1ba   :  { %v1054_v61 = vadd.f32 %v1053_v51, %v2732_v41  ;;  %v1072_v0 = vadd.f32 %v1071_v13, %v2732_v41  ;;  %1462 = vmatpush.bf16.msrb.mxu0 %v1229_v14  ;;  %1480 = vmatpush.bf16.msrb.mxu1 %v1232_v62  ;;  %v1019_v22 = vpop.f32.mrf.mxu0  ;;  %v1037_v48 = vpop.f32.mrf.mxu1  ;;  %v1105_v41 = vmax.f32 %v1051_v25, 0.0 }
 0x1bc   :  { %v1121_v38 = vmax.f32 %v1054_v61, 0.0  ;;  %v1122_v45 = vmax.f32 %v1072_v0, 0.0  ;;  %v1140_v49 = vpack.c.bf16 %v1105_v41, %v1089_v43 }
 0x1be   :  { %v1156_v63 = vpack.c.bf16 %v1121_v38, %v1121_v38  ;;  %v1157_v47 = vpack.c.bf16 %v1122_v45, %v1122_v45  ;;  %1463 = vmatpush.bf16.msrb.mxu0 %v1138_v4  ;;  %1481 = vmatpush.bf16.msrb.mxu1 %v1139_v15 }
 0x1c0   :  { %v1235_v30 = vsel %vm1191_vm1, %v1156_v63, 0  ;;  %v1238_v10 = vsel %vm1191_vm1, %v1157_v47, 0 }
 0x1c1   :  { %v1055_v20 = vpop.f32.mrf.mxu2  ;;  %v1073_v5 = vpop.f32.mrf.mxu3  ;;  %1498 = vmatpush.bf16.msrb.mxu2 %v1235_v30  ;;  %1516 = vmatpush.bf16.msrb.mxu3 %v1238_v10 }
 0x1c2   :  { %1730 = vmatmul.msk.bf16.vlgmr.msrb.gmra.mxu0 %vm1184_vm2, %v2755_v33  ;;  %1732 = vmatmul.msk.bf16.vlgmr.msrb.gmra.mxu1 %vm1184_vm2, %v2755_v33 }
 0x1c5   :  { %1499 = vmatpush.bf16.msrb.mxu2 %v1140_v49  ;;  %1517 = vmatpush.bf16.msrb.mxu3 %v1141_v40 }
 0x1c8   :  { %1734 = vmatmul.msk.bf16.vlgmr.msrb.gmra.mxu2 %vm1184_vm2, %v2755_v33  ;;  %1736 = vmatmul.msk.bf16.vlgmr.msrb.gmra.mxu3 %vm1184_vm2, %v2755_v33 }
 0x1d2   :  { %1731 = vmatmul.msk.bf16.gmra.mxu0 %vm1184_vm2, %v2770_v59  ;;  %1733 = vmatmul.msk.bf16.gmra.mxu1 %vm1184_vm2, %v2770_v59 }
 0x1d8   :  { %1735 = vmatmul.msk.bf16.gmra.mxu2 %vm1184_vm2, %v2770_v59  ;;  %1737 = vmatmul.msk.bf16.gmra.mxu3 %vm1184_vm2, %v2770_v59 }
 0x1de   :  { %v1249_v9 = vpop.f32.mrf.mxu0  ;;  %v1267_v11 = vpop.f32.mrf.mxu1 }
 0x1df   :  { %v1250_v26 = vadd.f32 %v1249_v9, %v2876_v55  ;;  %v1268_v33 = vadd.f32 %v1267_v11, %v2876_v55 }
 0x1e1   :  { %v1528_v54 = vmax.f32 %v1250_v26, 0.0  ;;  %v1529_v18 = vmax.f32 %v1268_v33, 0.0 }
 0x1e3   :  { %v1576_v19 = vadd.f32 %v1529_v18, %v1528_v54 }
 0x1e6   :  { %v1251_v16 = vpop.f32.mrf.mxu0  ;;  %v1269_v12 = vpop.f32.mrf.mxu1 }
 0x1e7   :  { %v1252_v24 = vadd.f32 %v1251_v16, %v2880_v39  ;;  %v1270_v42 = vadd.f32 %v1269_v12, %v2880_v39 }
 0x1e9   :  { %v1544_v59 = vmax.f32 %v1252_v24, 0.0  ;;  %v1545_v35 = vmax.f32 %v1270_v42, 0.0 }
 0x1ea   :  { %v1285_v32 = vpop.f32.mrf.mxu2  ;;  %v1303_v17 = vpop.f32.mrf.mxu3 }
 0x1eb   :  { %v1577_v52 = vadd.f32 %v1545_v35, %v1544_v59  ;;  %v1286_v3 = vadd.f32 %v1285_v32, %v2876_v55  ;;  %v1304_v28 = vadd.f32 %v1303_v17, %v2876_v55 }
 0x1ed   :  { %v1530_v21 = vmax.f32 %v1286_v3, 0.0  ;;  %v1531_v29 = vmax.f32 %v1304_v28, 0.0 }
 0x1ee   :  { %v1254_v2 = vpop.f32.mrf.mxu0  ;;  %v1272_v8 = vpop.f32.mrf.mxu1 }
 0x1ef   :  { %v1579_v27 = vadd.f32 %v1531_v29, %v1530_v21  ;;  %v1255_v23 = vadd.f32 %v1254_v2, %v2886_v60  ;;  %v1273_v1 = vadd.f32 %v1272_v8, %v2886_v60 }
 0x1f1   :  { %v2890_v34 = vadd.f32 %v1579_v27, %v1576_v19  ;;  %v1560_v46 = vmax.f32 %v1255_v23, 0.0  ;;  %v1561_v58 = vmax.f32 %v1273_v1, 0.0 }
 0x1f2   :  { %v1287_v36 = vpop.f32.mrf.mxu2  ;;  %v1305_v50 = vpop.f32.mrf.mxu3 }
 0x1f3   :  { %v1578_v53 = vadd.f32 %v1561_v58, %v1560_v46  ;;  %v1288_v51 = vadd.f32 %v1287_v36, %v2880_v39  ;;  %v1306_v13 = vadd.f32 %v1305_v50, %v2880_v39 }
 0x1f5   :  { %v1546_v14 = vmax.f32 %v1288_v51, 0.0  ;;  %v1547_v62 = vmax.f32 %v1306_v13, 0.0 }
 0x1f6   :  { %v1256_v6 = vpop.f32.mrf.mxu0  ;;  %v1274_v7 = vpop.f32.mrf.mxu1 }
 0x1f7   :  { %v1580_v61 = vadd.f32 %v1547_v62, %v1546_v14 }
 0x1f9   :  { %v2894_v0 = vadd.f32 %v1580_v61, %v1577_v52 }
 0x1fa   :  { %v1290_v22 = vpop.f32.mrf.mxu2  ;;  %v1308_v48 = vpop.f32.mrf.mxu3 }
 0x1fb   :  { %v1291_v25 = vadd.f32 %v1290_v22, %v2886_v60  ;;  %v1309_v37 = vadd.f32 %v1308_v48, %v2886_v60 }
 0x1fd   :  { %v1562_v4 = vmax.f32 %v1291_v25, 0.0  ;;  %v1563_v15 = vmax.f32 %v1309_v37, 0.0 }
 0x1ff   :  { %v1581_v38 = vadd.f32 %v1563_v15, %v1562_v4  ;;  %v1321_v45 = vpop.f32.mrf.mxu0  ;;  %v1339_v56 = vpop.f32.mrf.mxu1 }
 0x200   :  { %v1322_v31 = vadd.f32 %v1321_v45, %v2876_v55  ;;  %v1340_v63 = vadd.f32 %v1339_v56, %v2876_v55 }
 0x201   :  { %v1602_v47 = vadd.f32 %v1581_v38, %v1578_v53 }
 0x202   :  { %v1532_v41 = vmax.f32 %v1322_v31, 0.0  ;;  %v1533_v57 = vmax.f32 %v1340_v63, 0.0  ;;  %v1292_v30 = vpop.f32.mrf.mxu2  ;;  %v1310_v10 = vpop.f32.mrf.mxu3 }
 0x204   :  { %v1582_v43 = vadd.f32 %v1533_v57, %v1532_v41 }
 0x207   :  { %v1323_v44 = vpop.f32.mrf.mxu0  ;;  %v1341_v20 = vpop.f32.mrf.mxu1 }
 0x208   :  { %v1324_v5 = vadd.f32 %v1323_v44, %v2880_v39  ;;  %v1342_v49 = vadd.f32 %v1341_v20, %v2880_v39 }
 0x20a   :  { %v1548_v40 = vmax.f32 %v1324_v5, 0.0  ;;  %v1549_v9 = vmax.f32 %v1342_v49, 0.0 }
 0x20b   :  { %v1357_v11 = vpop.f32.mrf.mxu2  ;;  %v1375_v26 = vpop.f32.mrf.mxu3 }
 0x20c   :  { %v1583_v33 = vadd.f32 %v1549_v9, %v1548_v40  ;;  %v1358_v54 = vadd.f32 %v1357_v11, %v2876_v55  ;;  %v1376_v18 = vadd.f32 %v1375_v26, %v2876_v55 }
 0x20e   :  { %v1534_v19 = vmax.f32 %v1358_v54, 0.0  ;;  %v1535_v16 = vmax.f32 %v1376_v18, 0.0 }
 0x20f   :  { %v1326_v12 = vpop.f32.mrf.mxu0  ;;  %v1344_v24 = vpop.f32.mrf.mxu1 }
 0x210   :  { %v1585_v42 = vadd.f32 %v1535_v16, %v1534_v19  ;;  %v1327_v59 = vadd.f32 %v1326_v12, %v2886_v60  ;;  %v1345_v35 = vadd.f32 %v1344_v24, %v2886_v60 }
 0x212   :  { %v1603_v32 = vadd.f32 %v1585_v42, %v1582_v43  ;;  %v1564_v17 = vmax.f32 %v1327_v59, 0.0  ;;  %v1565_v52 = vmax.f32 %v1345_v35, 0.0 }
 0x213   :  { %v1359_v3 = vpop.f32.mrf.mxu2  ;;  %v1377_v28 = vpop.f32.mrf.mxu3 }
 0x214   :  { %v1584_v21 = vadd.f32 %v1565_v52, %v1564_v17  ;;  %v1360_v29 = vadd.f32 %v1359_v3, %v2880_v39  ;;  %v1378_v2 = vadd.f32 %v1377_v28, %v2880_v39  ;;  %v1612_v59 = vadd.f32 %v1603_v32, %v2890_v34 }
 0x216   :  { %v1550_v8 = vmax.f32 %v1360_v29, 0.0  ;;  %v1551_v27 = vmax.f32 %v1378_v2, 0.0 }
 0x217   :  { %v1328_v23 = vpop.f32.mrf.mxu0  ;;  %v1346_v1 = vpop.f32.mrf.mxu1 }
 0x218   :  { %v1586_v46 = vadd.f32 %v1551_v27, %v1550_v8 }
 0x21a   :  { %v1604_v58 = vadd.f32 %v1586_v46, %v1583_v33 }
 0x21b   :  { %v1362_v36 = vpop.f32.mrf.mxu2  ;;  %v1380_v50 = vpop.f32.mrf.mxu3 }
 0x21c   :  { %v1363_v53 = vadd.f32 %v1362_v36, %v2886_v60  ;;  %v1381_v51 = vadd.f32 %v1380_v50, %v2886_v60  ;;  %v2919_v12 = vadd.f32 %v1604_v58, %v2894_v0 }
 0x21e   :  { %v1566_v13 = vmax.f32 %v1363_v53, 0.0  ;;  %v1567_v14 = vmax.f32 %v1381_v51, 0.0 }
 0x21f   :  { %v1393_v62 = vpop.f32.mrf.mxu0  ;;  %v1411_v6 = vpop.f32.mrf.mxu1 }
 0x220   :  { %v1587_v7 = vadd.f32 %v1567_v14, %v1566_v13  ;;  %v1394_v61 = vadd.f32 %v1393_v62, %v2876_v55  ;;  %v1412_v22 = vadd.f32 %v1411_v6, %v2876_v55 }
 0x222   :  { %v1605_v48 = vadd.f32 %v1587_v7, %v1584_v21  ;;  %v1536_v25 = vmax.f32 %v1394_v61, 0.0  ;;  %v1537_v37 = vmax.f32 %v1412_v22, 0.0 }
 0x223   :  { %v1364_v4 = vpop.f32.mrf.mxu2  ;;  %v1382_v15 = vpop.f32.mrf.mxu3 }
 0x224   :  { %v2912_v38 = vadd.f32 %v1605_v48, %v1602_v47  ;;  %v1588_v45 = vadd.f32 %v1537_v37, %v1536_v25 }
 0x227   :  { %v1395_v56 = vpop.f32.mrf.mxu0  ;;  %v1413_v31 = vpop.f32.mrf.mxu1 }
 0x228   :  { %v1396_v51 = vadd.f32 %v1395_v56, %v2880_v39  ;;  %v1414_v22 = vadd.f32 %v1413_v31, %v2880_v39 }
 0x22b   :  { %v1429_v63 = vpop.f32.mrf.mxu2  ;;  %v1447_v41 = vpop.f32.mrf.mxu3 }
 0x22c   :  { %v1430_v47 = vadd.f32 %v1429_v63, %v2876_v55  ;;  %v1448_v33 = vadd.f32 %v1447_v41, %v2876_v55  ;;  %v1552_v41 = vmax.f32 %v1396_v51, 0.0 }
 0x22e   :  { %v1538_v24 = vmax.f32 %v1430_v47, 0.0  ;;  %v1539_v42 = vmax.f32 %v1448_v33, 0.0 }
 0x22f   :  { %v1398_v57 = vpop.f32.mrf.mxu0  ;;  %v1416_v30 = vpop.f32.mrf.mxu1 }
 0x230   :  { %v1591_v29 = vadd.f32 %v1539_v42, %v1538_v24  ;;  %v1399_v48 = vadd.f32 %v1398_v57, %v2886_v60  ;;  %v1417_v25 = vadd.f32 %v1416_v30, %v2886_v60 }
 0x232   :  { %v1606_v46 = vadd.f32 %v1591_v29, %v1588_v45  ;;  %v1568_v31 = vmax.f32 %v1399_v48, 0.0  ;;  %v1569_v57 = vmax.f32 %v1417_v25, 0.0 }
 0x233   :  { %v1431_v10 = vpop.f32.mrf.mxu2  ;;  %v1449_v43 = vpop.f32.mrf.mxu3 }
 0x234   :  { %v1450_v13 = vadd.f32 %v1449_v43, %v2880_v39 }
 0x236   :  { %v1555_v43 = vmax.f32 %v1450_v13, 0.0 }
 0x237   :  { %v1400_v44 = vpop.f32.mrf.mxu0  ;;  %v1418_v20 = vpop.f32.mrf.mxu1 }
 0x23b   :  { %v1434_v5 = vpop.f32.mrf.mxu2  ;;  %v1452_v49 = vpop.f32.mrf.mxu3 }
 0x23c   :  { %v1435_v14 = vadd.f32 %v1434_v5, %v2886_v60  ;;  %v1453_v62 = vadd.f32 %v1452_v49, %v2886_v60 }
 0x23e   :  { %v1570_v44 = vmax.f32 %v1435_v14, 0.0  ;;  %v1571_v20 = vmax.f32 %v1453_v62, 0.0 }
 0x23f   :  { %v1465_v40 = vpop.f32.mrf.mxu0  ;;  %v1483_v9 = vpop.f32.mrf.mxu1 }
 0x240   :  { %v1466_v19 = vadd.f32 %v1465_v40, %v2876_v55  ;;  %v1484_v16 = vadd.f32 %v1483_v9, %v2876_v55 }
 0x242   :  { %v1540_v52 = vmax.f32 %v1466_v19, 0.0  ;;  %v1541_v3 = vmax.f32 %v1484_v16, 0.0 }
 0x243   :  { %v1436_v11 = vpop.f32.mrf.mxu2  ;;  %v1454_v26 = vpop.f32.mrf.mxu3 }
 0x244   :  { %v1594_v1 = vadd.f32 %v1541_v3, %v1540_v52 }
 0x247   :  { %v1467_v54 = vpop.f32.mrf.mxu0  ;;  %v1485_v18 = vpop.f32.mrf.mxu1 }
 0x248   :  { %v1468_v6 = vadd.f32 %v1467_v54, %v2880_v39  ;;  %v1486_v7 = vadd.f32 %v1485_v18, %v2880_v39  ;;  %v1593_v18 = vadd.f32 %v1571_v20, %v1570_v44 }
 0x24a   :  { %v1556_v5 = vmax.f32 %v1468_v6, 0.0  ;;  %v1557_v49 = vmax.f32 %v1486_v7, 0.0 }
 0x24b   :  { %v1501_v35 = vpop.f32.mrf.mxu2  ;;  %v1519_v17 = vpop.f32.mrf.mxu3 }
 0x24c   :  { %v1502_v28 = vadd.f32 %v1501_v35, %v2876_v55  ;;  %v1520_v21 = vadd.f32 %v1519_v17, %v2876_v55  ;;  %v1432_v55 = vadd.f32 %v1431_v10, %v2880_v39  ;;  %v1595_v19 = vadd.f32 %v1557_v49, %v1556_v5 }
 0x24e   :  { %v1542_v2 = vmax.f32 %v1502_v28, 0.0  ;;  %v1543_v8 = vmax.f32 %v1520_v21, 0.0  ;;  %v1554_v10 = vmax.f32 %v1432_v55, 0.0 }
 0x24f   :  { %v1470_v27 = vpop.f32.mrf.mxu0  ;;  %v1488_v23 = vpop.f32.mrf.mxu1 }
 0x250   :  { %v1597_v0 = vadd.f32 %v1543_v8, %v1542_v2  ;;  %v1471_v37 = vadd.f32 %v1470_v27, %v2886_v60  ;;  %v1489_v45 = vadd.f32 %v1488_v23, %v2886_v60  ;;  %v1592_v54 = vadd.f32 %v1555_v43, %v1554_v10 }
 0x252   :  { %v1609_v58 = vadd.f32 %v1597_v0, %v1594_v1  ;;  %v1572_v40 = vmax.f32 %v1471_v37, 0.0  ;;  %v1573_v11 = vmax.f32 %v1489_v45, 0.0  ;;  %v1621_v1 = vld [vmem:[%s2956_s7] sm:$0x1] }
 0x253   :  { %v1503_v36 = vpop.f32.mrf.mxu2  ;;  %v1521_v50 = vpop.f32.mrf.mxu3 }
 0x254   :  { %v1504_v34 = vadd.f32 %v1503_v36, %v2880_v39  ;;  %v1522_v32 = vadd.f32 %v1521_v50, %v2880_v39  ;;  %v1615_v53 = vadd.f32 %v1609_v58, %v1606_v46  ;;  %v1553_v39 = vmax.f32 %v1414_v22, 0.0 }
 0x255   :  { %v1596_v35 = vadd.f32 %v1573_v11, %v1572_v40 }
 0x256   :  { %v1618_v61 = vadd.f32 %v1615_v53, %v1612_v59  ;;  %v1558_v56 = vmax.f32 %v1504_v34, 0.0  ;;  %v1559_v63 = vmax.f32 %v1522_v32, 0.0  ;;  %v1589_v42 = vadd.f32 %v1553_v39, %v1552_v41 }
 0x257   :  { %v1472_v4 = vpop.f32.mrf.mxu0  ;;  %v1490_v15 = vpop.f32.mrf.mxu1  ;;  %v1590_v59 = vadd.f32 %v1569_v57, %v1568_v31 }
 0x258   :  { %v1598_v26 = vadd.f32 %v1559_v63, %v1558_v56  ;;  %v1607_v3 = vadd.f32 %v1592_v54, %v1589_v42 }
 0x259   :  { %v1608_v28 = vadd.f32 %v1593_v18, %v1590_v59 }
 0x25a   :  { %v1610_v17 = vadd.f32 %v1598_v26, %v1595_v19 }
 0x25b   :  { %v1506_v30 = vpop.f32.mrf.mxu2  ;;  %v1524_v9 = vpop.f32.mrf.mxu3 }
 0x25c   :  { %v1507_v47 = vadd.f32 %v1506_v30, %v2886_v60  ;;  %v1525_v33 = vadd.f32 %v1524_v9, %v2886_v60  ;;  %v1616_v27 = vadd.f32 %v1610_v17, %v1607_v3 }
 0x25e   :  { %v1574_v16 = vmax.f32 %v1507_v47, 0.0  ;;  %v1575_v24 = vmax.f32 %v1525_v33, 0.0  ;;  %v1619_v23 = vadd.f32 %v1616_v27, %v2919_v12 }
 0x260   :  { %v1599_v52 = vadd.f32 %v1575_v24, %v1574_v16 }
 0x262   :  { %v1611_v21 = vadd.f32 %v1599_v52, %v1596_v35 }
 0x263   :  { %v1508_v29 = vpop.f32.mrf.mxu2  ;;  %v1526_v2 = vpop.f32.mrf.mxu3 }
 0x264   :  { %v1617_v8 = vadd.f32 %v1611_v21, %v1608_v28 }
 0x266   :  { %v1620_v60 = vadd.f32 %v1617_v8, %v2912_v38 }
 0x268   :  { %1738 = vmatpush.msk.msra.mxu0 %vm1625_vm3, %v1620_v60 }
 0x26a   :  { %1643 = vmatpush.msra.mxu0 %v1619_v23 }
 0x26c   :  { %1644 = vmatpush.msra.mxu0 %v1618_v61 }
 0x26d   :  { %1739 = vmatmul.msk.f32.vlgmr.msra.gmra.mxu0 %vm1184_vm2, %v1621_v1 }
 0x2ea   :  { %v1646_v38 = vpop.f32.mrf.mxu0 }
 0x2eb   :  { %1649 = vst [vmem:[#allocation2] sm:$0x1] %v1646_v38 }
 0x2ec   :  { %1660 = dma.vmem_to_hbm [thread:$0]  %s1656_s2, 16, %s1658_s10, [#allocation3]  }
 0x2ed   :  { %1780 = dma.done.wait [#allocation3], 16  }
 0x2ee   :  { %1781 = vsyncadd [#allocation3], 4294967280 }
 0x2ef   :  { %1665 = vsyncpa [#allocation3], 1 }

</bundles_post_ra>
